<compile_context>
chip_gen: v5e
topology: v5e:2x2
jax: 0.10.0
libtpu: 0.0.40
codegen_flags: <defaults>
</compile_context>

<pallas_src>
import functools

import jax
import jax.numpy as jnp
from jax import lax
from jax.experimental import pallas as pl
from jax.experimental.pallas import tpu as pltpu

EMBED_DIM = 179          # TokenEmbedding.embedding_dim
INPUT_DIM = 180          # embedding_dim + 1
HIDDEN = 180             # nn.LSTM(180, 180)
FF_HIDDEN = 80           # nn.Linear(180, 80)

HPAD = 256               # per-gate lane padding (vreg/MXU aligned)
INPUT_PAD = 256          # padded input-feature dim (contraction dim of x @ W_ih)
FF_PAD = 128             # padded FF hidden dim
EMB_ROWS_PAD = 128       # builtin-embedding rows (122) padded to 128


# ---------------------------------------------------------------------------
# Pallas kernel: fused embedding gather + hoisted input projection +
#                LSTM recurrence + FF head on h_n
# ---------------------------------------------------------------------------
def _lstm_ff_kernel(seq_ref, tok_ref, emb_ref, wih_ref, whh_ref, b_ref,
                    w1_ref, b1_ref, w2_ref, b2_ref, o_ref, gx_ref):
    """seq_ref: (1,)        i32 SMEM  actual sequence length
       tok_ref: (S_pad, 2)  i32 VMEM  tokens (id, kind); pad rows arbitrary (row-masked)
       emb_ref: (128, 256)  f32       builtin embedding table, zero-padded
       wih_ref: (256, 1024) f32       gate-padded weight_ih_l0.T  (gate order i,f,g,o)
       whh_ref: (256, 1024) bf16      gate-padded weight_hh_l0.T
       b_ref:   (1, 1024)   f32       gate-padded (bias_ih + bias_hh)
       w1_ref:  (256, 128)  f32       padded ff[0].weight.T
       b1_ref:  (1, 128)    f32       padded ff[0].bias
       w2_ref:  (1, 128)    f32       padded ff[2].weight (row vector)
       b2_ref:  (1, 1)      f32       ff[2].bias
       o_ref:   (1, 1)      f32       ff(h_n)
       gx_ref:  (S_pad, 1024) f32     VMEM scratch for the hoisted input projection
    """
    s_pad = tok_ref.shape[0]
    seq_len = seq_ref[0]

    # ---- Fused TokenEmbedding (one-hot MXU gather; reference semantics preserved) ----
    toks = tok_ref[...]                                   # (S_pad, 2) i32
    ids = toks[:, 0:1]                                    # (S_pad, 1)
    kind = toks[:, 1:2]                                   # (S_pad, 1)

    lane = lax.broadcasted_iota(jnp.int32, (s_pad, EMB_ROWS_PAD), 1)
    onehot = (lane == ids).astype(jnp.float32)            # ids >= 128 -> all-zero row
    emb = jnp.dot(onehot, emb_ref[...], preferred_element_type=jnp.float32)  # (S_pad,256)

    is_builtin = kind == 0
    is_variable = kind == 1
    is_number = kind == 1    # same condition as the reference code ("bug" kept):
                             # variable rows are immediately zeroed, so the (10000,179)
                             # variable-embedding gather never reaches the output.

    emb = jnp.where(is_builtin, emb, 0.0)

    last = jnp.where(is_builtin | is_variable, -1.0, 0.0)          # (S_pad, 1)
    last = jnp.where(is_number, ids.astype(jnp.float32), last)     # exact in f32

    col = lax.broadcasted_iota(jnp.int32, (1, INPUT_PAD), 1)
    x = emb + last * (col == EMBED_DIM).astype(jnp.float32)        # set column 179

    row = lax.broadcasted_iota(jnp.int32, (s_pad, 1), 0)
    x = jnp.where(row < seq_len, x, 0.0)                           # zero pad rows

    # ---- Hoisted input projection: one (S_pad, 4*HPAD) f32 MXU matmul + bias ----
    gx_ref[...] = (jnp.dot(x, wih_ref[...], preferred_element_type=jnp.float32)
                   + b_ref[...])

    # ---- LSTM recurrence ----
    def sig(v):
        # sigmoid via tanh: EUP slot instead of a VPU divide on the critical chain.
        return 0.5 * jnp.tanh(0.5 * v) + 0.5

    def step(t, carry):
        h, c = carry                                      # (1, HPAD) f32; pad lanes == 0
        # whh_ref indexed here (not hoisted): per-tile reads fuse into the matmul and
        # W_hh never becomes a 128-vreg live value across iterations.
        gates = gx_ref[pl.ds(t, 1), :] + jnp.dot(
            h.astype(jnp.bfloat16), whh_ref[...], preferred_element_type=jnp.float32)
        i = sig(gates[:, 0 * HPAD:1 * HPAD])              # 256-aligned whole-vreg slices
        f = sig(gates[:, 1 * HPAD:2 * HPAD])
        g = jnp.tanh(gates[:, 2 * HPAD:3 * HPAD])
        o = sig(gates[:, 3 * HPAD:4 * HPAD])
        c = f * c + i * g                                 # pad lanes stay exactly 0
        h = o * jnp.tanh(c)
        return h, c

    h0 = jnp.zeros((1, HPAD), jnp.float32)
    c0 = jnp.zeros((1, HPAD), jnp.float32)
    h_n, _ = lax.fori_loop(0, seq_len, step, (h0, c0))    # dynamic bound, no recompile

    # ---- Feed-forward head: Linear(180, 80) -> ELU -> Linear(80, 1) ----
    y1 = jnp.dot(h_n, w1_ref[...], preferred_element_type=jnp.float32) + b1_ref[...]
    neg = jnp.exp(jnp.minimum(y1, 0.0)) - 1.0             # ELU(alpha=1), no inf pos side
    y1 = jnp.where(y1 > 0.0, y1, neg)                     # pad lanes: ELU(0) == 0
    y2 = jnp.sum(y1 * w2_ref[...], axis=1, keepdims=True) + b2_ref[...]
    o_ref[...] = y2


def lstm_ff_pallas(tokens_padded, seq_len_arr, params):
    s_pad = tokens_padded.shape[0]
    gx_bytes = s_pad * 4 * HPAD * 4
    vmem_limit = int(min(96 * 2**20, 16 * 2**20 + 2 * gx_bytes))
    vmem = pl.BlockSpec(memory_space=pltpu.MemorySpace.VMEM)
    smem = pl.BlockSpec(memory_space=pltpu.MemorySpace.SMEM)
    return pl.pallas_call(
        _lstm_ff_kernel,
        out_shape=jax.ShapeDtypeStruct((1, 1), jnp.float32),
        in_specs=[smem] + [vmem] * 9,
        out_specs=vmem,
        scratch_shapes=[pltpu.VMEM((s_pad, 4 * HPAD), jnp.float32)],
        compiler_params=pltpu.CompilerParams(vmem_limit_bytes=vmem_limit),
    )(seq_len_arr, tokens_padded, params["emb_p"],
      params["w_ih_p"], params["w_hh_p"], params["b_p"],
      params["w1_p"], params["b1_p"], params["w2_p"], params["b2"])


# ---------------------------------------------------------------------------
# Full forward: tokens -> (fused embedding + LSTM + ff(h_n)), output (1, 1, 1)
# ---------------------------------------------------------------------------
@jax.jit
def _forward_jit(tokens_padded, seq_len_arr, params):
    return lstm_ff_pallas(tokens_padded, seq_len_arr, params).reshape(1, 1, 1)


def _next_pow2(n):
    return 1 if n <= 1 else 1 << (n - 1).bit_length()


def single_layer_lstm_forward(tokens, params):
    """tokens: (S, 2) int32 (what tvm tokenize_stmt would produce) -> (1, 1, 1) f32."""
    seq_len = int(tokens.shape[0])
    s_pad = max(8, _next_pow2(seq_len))   # bucketed pad -> one compile per bucket
    tokens_padded = jnp.zeros((s_pad, 2), jnp.int32).at[:seq_len].set(
        tokens.astype(jnp.int32))
    return _forward_jit(tokens_padded, jnp.array([seq_len], jnp.int32), params)


# ---------------------------------------------------------------------------
# Deterministic parameter construction (shapes from __init__), with gate padding
# ---------------------------------------------------------------------------
def _pad_gate_matrix(w_t, in_pad):
    """(in_dim, 4*HIDDEN) -> (in_pad, 4*HPAD); gate k at columns [k*HPAD, k*HPAD+HIDDEN)."""
    in_dim = w_t.shape[0]
    out = jnp.zeros((in_pad, 4 * HPAD), w_t.dtype)
    for k in range(4):
        out = out.at[:in_dim, k * HPAD:k * HPAD + HIDDEN].set(
            w_t[:, k * HIDDEN:(k + 1) * HIDDEN])
    return out


def make_params(key):
    ks = jax.random.split(key, 10)
    k_lstm = 1.0 / jnp.sqrt(jnp.float32(HIDDEN))
    k_ff1 = 1.0 / jnp.sqrt(jnp.float32(INPUT_DIM))
    k_ff2 = 1.0 / jnp.sqrt(jnp.float32(FF_HIDDEN))

    w_ih = jax.random.uniform(ks[0], (4 * HIDDEN, INPUT_DIM), jnp.float32, -k_lstm, k_lstm)
    w_hh = jax.random.uniform(ks[1], (4 * HIDDEN, HIDDEN), jnp.float32, -k_lstm, k_lstm)
    b_ih = jax.random.uniform(ks[2], (4 * HIDDEN,), jnp.float32, -k_lstm, k_lstm)
    b_hh = jax.random.uniform(ks[3], (4 * HIDDEN,), jnp.float32, -k_lstm, k_lstm)

    w1 = jax.random.uniform(ks[4], (FF_HIDDEN, INPUT_DIM), jnp.float32, -k_ff1, k_ff1)
    b1 = jax.random.uniform(ks[5], (FF_HIDDEN,), jnp.float32, -k_ff1, k_ff1)
    w2 = jax.random.uniform(ks[6], (1, FF_HIDDEN), jnp.float32, -k_ff2, k_ff2)
    b2 = jax.random.uniform(ks[7], (1,), jnp.float32, -k_ff2, k_ff2)

    builtin_emb = 0.02 * jax.random.normal(ks[8], (122, EMBED_DIM), jnp.float32)
    variable_emb = 0.02 * jax.random.normal(ks[9], (10000, EMBED_DIM), jnp.float32)

    # Builtin table padded to an MXU-friendly (128, 256) VMEM-resident slab.
    emb_p = jnp.zeros((EMB_ROWS_PAD, INPUT_PAD), jnp.float32)
    emb_p = emb_p.at[:122, :EMBED_DIM].set(builtin_emb)

    # Gate-padded, MXU-friendly layouts (pre-transposed to (in, out)).
    # W_ih stays f32 so the raw-token-id "last" column contributes exactly;
    # W_hh is bf16 with f32 accumulation (small documented drift).
    w_ih_p = _pad_gate_matrix(w_ih.T, INPUT_PAD)                        # (256, 1024) f32
    w_hh_p = _pad_gate_matrix(w_hh.T, HPAD).astype(jnp.bfloat16)        # (256, 1024) bf16
    b_p = _pad_gate_matrix((b_ih + b_hh)[None, :], 1)                   # (1, 1024) f32

    w1_p = jnp.zeros((HPAD, FF_PAD), jnp.float32).at[:INPUT_DIM, :FF_HIDDEN].set(w1.T)
    b1_p = jnp.zeros((1, FF_PAD), jnp.float32).at[0, :FF_HIDDEN].set(b1)
    w2_p = jnp.zeros((1, FF_PAD), jnp.float32).at[0, :FF_HIDDEN].set(w2[0])

    return {
        # variable_emb mirrors the module's parameter but never reaches the output
        # (the reference's is_number mask aliases is_variable and zeros those rows).
        "variable_emb": variable_emb,
        "emb_p": emb_p,
        "w_ih_p": w_ih_p,
        "w_hh_p": w_hh_p,
        "b_p": b_p,
        "w1_p": w1_p,
        "b1_p": b1_p,
        "w2_p": w2_p,
        "b2": b2[None, :],                    # (1, 1)
    }


if __name__ == "__main__":
    key = jax.random.PRNGKey(0)
    k_params, k_ids, k_kind = jax.random.split(key, 3)

    params = make_params(k_params)

    # Small synthetic token stream (what tokenize_stmt would produce): (S, 2)
    S = 8
    tok_ids = jax.random.randint(k_ids, (S,), 0, 122, dtype=jnp.int32)
    tok_kind = jax.random.randint(k_kind, (S,), 0, 3, dtype=jnp.int32)
    tokens = jnp.stack([tok_ids, tok_kind], axis=1)      # (8, 2) int32

    out = single_layer_lstm_forward(tokens, params)
    jax.block_until_ready(out)
    assert out.shape == (1, 1, 1) and out.dtype == jnp.float32
    print("KERNEL_OK")
</pallas_src>

<mosaic_0001>
module attributes {stable_mosaic.version = 11 : i64} {
  func.func @_lstm_ff_kernel(%arg0: memref<1xi32, #tpu.memory_space<smem>>, %arg1: memref<8x2xi32, #tpu.memory_space<vmem>>, %arg2: memref<128x256xf32, #tpu.memory_space<vmem>>, %arg3: memref<256x1024xf32, #tpu.memory_space<vmem>>, %arg4: memref<256x1024xbf16, #tpu.memory_space<vmem>>, %arg5: memref<1x1024xf32, #tpu.memory_space<vmem>>, %arg6: memref<256x128xf32, #tpu.memory_space<vmem>>, %arg7: memref<1x128xf32, #tpu.memory_space<vmem>>, %arg8: memref<1x128xf32, #tpu.memory_space<vmem>>, %arg9: memref<1x1xf32, #tpu.memory_space<vmem>>, %arg10: memref<1x1xf32, #tpu.memory_space<vmem>>, %arg11: memref<8x1024xf32, #tpu.memory_space<vmem>>) attributes {dimension_semantics = [], scalar_prefetch = 0 : i64, scratch_operands = 1 : i64, tpu.core_type = #tpu.core_type<tc>} {
    %c0 = arith.constant 0 : index
    %0 = memref.load %arg0[%c0] : memref<1xi32, #tpu.memory_space<smem>>
    %c0_0 = arith.constant 0 : index
    %c0_1 = arith.constant 0 : index
    %1 = vector.load %arg1[%c0_0, %c0_1] : memref<8x2xi32, #tpu.memory_space<vmem>>, vector<8x2xi32>
    %2 = vector.extract_strided_slice %1 {offsets = [0, 0], sizes = [8, 1], strides = [1, 1]} : vector<8x2xi32> to vector<8x1xi32>
    %3 = vector.extract_strided_slice %1 {offsets = [0, 1], sizes = [8, 1], strides = [1, 1]} : vector<8x2xi32> to vector<8x1xi32>
    %4 = tpu.iota {dimensions = array<i32: 1>} : vector<8x128xi32>
    %5 = vector.broadcast %2 : vector<8x1xi32> to vector<8x128xi32>
    %6 = arith.cmpi eq, %4, %5 : vector<8x128xi32>
    %7 = arith.extui %6 : vector<8x128xi1> to vector<8x128xi32>
    %8 = arith.sitofp %7 : vector<8x128xi32> to vector<8x128xf32>
    %c0_2 = arith.constant 0 : index
    %c0_3 = arith.constant 0 : index
    %9 = vector.load %arg2[%c0_2, %c0_3] : memref<128x256xf32, #tpu.memory_space<vmem>>, vector<128x256xf32>
    %cst = arith.constant dense<0.000000e+00> : vector<8x256xf32>
    %10 = tpu.matmul %8, %9, %cst {dimension_numbers = #tpu.dot_dimension_numbers<[1], [0], [0], [1], [0, 0, 1, 1], [], []>} : vector<8x128xf32>, vector<128x256xf32>, vector<8x256xf32> -> vector<8x256xf32>
    %c0_i32 = arith.constant 0 : i32
    %11 = vector.broadcast %c0_i32 : i32 to vector<8x1xi32>
    %12 = arith.cmpi eq, %3, %11 : vector<8x1xi32>
    %c1_i32 = arith.constant 1 : i32
    %13 = vector.broadcast %c1_i32 : i32 to vector<8x1xi32>
    %14 = arith.cmpi eq, %3, %13 : vector<8x1xi32>
    %c1_i32_4 = arith.constant 1 : i32
    %15 = vector.broadcast %c1_i32_4 : i32 to vector<8x1xi32>
    %16 = arith.cmpi eq, %3, %15 : vector<8x1xi32>
    %cst_5 = arith.constant 0.000000e+00 : f32
    %17 = vector.shape_cast %12 : vector<8x1xi1> to vector<8x1xi1>
    %18 = vector.broadcast %17 : vector<8x1xi1> to vector<8x256xi1>
    %19 = vector.broadcast %cst_5 : f32 to vector<8x256xf32>
    %20 = arith.select %18, %10, %19 : vector<8x256xi1>, vector<8x256xf32>
    %21 = arith.ori %12, %14 : vector<8x1xi1>
    %cst_6 = arith.constant -1.000000e+00 : f32
    %cst_7 = arith.constant 0.000000e+00 : f32
    %22 = vector.broadcast %cst_6 : f32 to vector<8x1xf32>
    %23 = vector.broadcast %cst_7 : f32 to vector<8x1xf32>
    %24 = arith.select %21, %22, %23 : vector<8x1xi1>, vector<8x1xf32>
    %25 = arith.sitofp %2 : vector<8x1xi32> to vector<8x1xf32>
    %26 = arith.select %16, %25, %24 : vector<8x1xi1>, vector<8x1xf32>
    %27 = tpu.iota {dimensions = array<i32: 1>} : vector<1x256xi32>
    %c179_i32 = arith.constant 179 : i32
    %28 = vector.broadcast %c179_i32 : i32 to vector<1x256xi32>
    %29 = arith.cmpi eq, %27, %28 : vector<1x256xi32>
    %30 = arith.extui %29 : vector<1x256xi1> to vector<1x256xi32>
    %31 = arith.sitofp %30 : vector<1x256xi32> to vector<1x256xf32>
    %32 = vector.broadcast %26 : vector<8x1xf32> to vector<8x256xf32>
    %33 = vector.broadcast %31 : vector<1x256xf32> to vector<8x256xf32>
    %34 = arith.mulf %32, %33 : vector<8x256xf32>
    %35 = arith.addf %20, %34 : vector<8x256xf32>
    %36 = tpu.iota {dimensions = array<i32: 0>} : vector<8x1xi32>
    %37 = vector.broadcast %0 : i32 to vector<8x1xi32>
    %38 = arith.cmpi slt, %36, %37 : vector<8x1xi32>
    %cst_8 = arith.constant 0.000000e+00 : f32
    %39 = vector.shape_cast %38 : vector<8x1xi1> to vector<8x1xi1>
    %40 = vector.broadcast %39 : vector<8x1xi1> to vector<8x256xi1>
    %41 = vector.broadcast %cst_8 : f32 to vector<8x256xf32>
    %42 = arith.select %40, %35, %41 : vector<8x256xi1>, vector<8x256xf32>
    %c0_9 = arith.constant 0 : index
    %c0_10 = arith.constant 0 : index
    %43 = vector.load %arg3[%c0_9, %c0_10] : memref<256x1024xf32, #tpu.memory_space<vmem>>, vector<256x1024xf32>
    %cst_11 = arith.constant dense<0.000000e+00> : vector<8x1024xf32>
    %44 = tpu.matmul %42, %43, %cst_11 {dimension_numbers = #tpu.dot_dimension_numbers<[1], [0], [0], [1], [0, 0, 1, 1], [], []>} : vector<8x256xf32>, vector<256x1024xf32>, vector<8x1024xf32> -> vector<8x1024xf32>
    %c0_12 = arith.constant 0 : index
    %c0_13 = arith.constant 0 : index
    %45 = vector.load %arg5[%c0_12, %c0_13] : memref<1x1024xf32, #tpu.memory_space<vmem>>, vector<1x1024xf32>
    %46 = vector.broadcast %45 : vector<1x1024xf32> to vector<8x1024xf32>
    %47 = arith.addf %44, %46 : vector<8x1024xf32>
    %c0_14 = arith.constant 0 : index
    %c0_15 = arith.constant 0 : index
    %48 = vector.load %arg11[%c0_14, %c0_15] : memref<8x1024xf32, #tpu.memory_space<vmem>>, vector<8x1024xf32>
    tpu.vector_store %arg11[%c0_14, %c0_15], %47 {strides = array<i32>} : memref<8x1024xf32, #tpu.memory_space<vmem>>, vector<8x1024xf32>,
    %cst_16 = arith.constant 0.000000e+00 : f32
    %49 = vector.broadcast %cst_16 : f32 to vector<1x256xf32>
    %cst_17 = arith.constant 0.000000e+00 : f32
    %50 = vector.broadcast %cst_17 : f32 to vector<1x256xf32>
    %c0_i32_18 = arith.constant 0 : i32
    %51 = arith.subi %0, %c0_i32_18 : i32
    %52 = arith.addi %c0_i32_18, %51 : i32
    %c1_i32_19 = arith.constant 1 : i32
    %53:2 = scf.for %arg12 = %c0_i32_18 to %52 step %c1_i32_19 iter_args(%arg13 = %49, %arg14 = %50) -> (vector<1x256xf32>, vector<1x256xf32>)  : i32 {
      %73 = arith.index_cast %arg12 : i32 to index
      %c0_35 = arith.constant 0 : index
      %74 = vector.load %arg11[%73, %c0_35] : memref<8x1024xf32, #tpu.memory_space<vmem>>, vector<1x1024xf32>
      %75 = arith.truncf %arg13 : vector<1x256xf32> to vector<1x256xbf16>
      %c0_36 = arith.constant 0 : index
      %c0_37 = arith.constant 0 : index
      %76 = vector.load %arg4[%c0_36, %c0_37] : memref<256x1024xbf16, #tpu.memory_space<vmem>>, vector<256x1024xbf16>
      %cst_38 = arith.constant dense<0.000000e+00> : vector<1x1024xf32>
      %77 = tpu.matmul %75, %76, %cst_38 {dimension_numbers = #tpu.dot_dimension_numbers<[1], [0], [0], [1], [0, 0, 1, 1], [], []>} : vector<1x256xbf16>, vector<256x1024xbf16>, vector<1x1024xf32> -> vector<1x1024xf32>
      %78 = arith.addf %74, %77 : vector<1x1024xf32>
      %79 = vector.extract_strided_slice %78 {offsets = [0, 0], sizes = [1, 256], strides = [1, 1]} : vector<1x1024xf32> to vector<1x256xf32>
      %cst_39 = arith.constant 5.000000e-01 : f32
      %80 = vector.broadcast %cst_39 : f32 to vector<1x256xf32>
      %81 = arith.mulf %80, %79 : vector<1x256xf32>
      %82 = math.tanh %81 : vector<1x256xf32>
      %cst_40 = arith.constant 5.000000e-01 : f32
      %83 = vector.broadcast %cst_40 : f32 to vector<1x256xf32>
      %84 = arith.mulf %83, %82 : vector<1x256xf32>
      %cst_41 = arith.constant 5.000000e-01 : f32
      %85 = vector.broadcast %cst_41 : f32 to vector<1x256xf32>
      %86 = arith.addf %84, %85 : vector<1x256xf32>
      %87 = vector.extract_strided_slice %78 {offsets = [0, 256], sizes = [1, 256], strides = [1, 1]} : vector<1x1024xf32> to vector<1x256xf32>
      %cst_42 = arith.constant 5.000000e-01 : f32
      %88 = vector.broadcast %cst_42 : f32 to vector<1x256xf32>
      %89 = arith.mulf %88, %87 : vector<1x256xf32>
      %90 = math.tanh %89 : vector<1x256xf32>
      %cst_43 = arith.constant 5.000000e-01 : f32
      %91 = vector.broadcast %cst_43 : f32 to vector<1x256xf32>
      %92 = arith.mulf %91, %90 : vector<1x256xf32>
      %cst_44 = arith.constant 5.000000e-01 : f32
      %93 = vector.broadcast %cst_44 : f32 to vector<1x256xf32>
      %94 = arith.addf %92, %93 : vector<1x256xf32>
      %95 = vector.extract_strided_slice %78 {offsets = [0, 512], sizes = [1, 256], strides = [1, 1]} : vector<1x1024xf32> to vector<1x256xf32>
      %96 = math.tanh %95 : vector<1x256xf32>
      %97 = vector.extract_strided_slice %78 {offsets = [0, 768], sizes = [1, 256], strides = [1, 1]} : vector<1x1024xf32> to vector<1x256xf32>
      %cst_45 = arith.constant 5.000000e-01 : f32
      %98 = vector.broadcast %cst_45 : f32 to vector<1x256xf32>
      %99 = arith.mulf %98, %97 : vector<1x256xf32>
      %100 = math.tanh %99 : vector<1x256xf32>
      %cst_46 = arith.constant 5.000000e-01 : f32
      %101 = vector.broadcast %cst_46 : f32 to vector<1x256xf32>
      %102 = arith.mulf %101, %100 : vector<1x256xf32>
      %cst_47 = arith.constant 5.000000e-01 : f32
      %103 = vector.broadcast %cst_47 : f32 to vector<1x256xf32>
      %104 = arith.addf %102, %103 : vector<1x256xf32>
      %105 = arith.mulf %94, %arg14 : vector<1x256xf32>
      %106 = arith.mulf %86, %96 : vector<1x256xf32>
      %107 = arith.addf %105, %106 : vector<1x256xf32>
      %108 = math.tanh %107 : vector<1x256xf32>
      %109 = arith.mulf %104, %108 : vector<1x256xf32>
      scf.yield %109, %107 : vector<1x256xf32>, vector<1x256xf32>
    }
    %c0_20 = arith.constant 0 : index
    %c0_21 = arith.constant 0 : index
    %54 = vector.load %arg6[%c0_20, %c0_21] : memref<256x128xf32, #tpu.memory_space<vmem>>, vector<256x128xf32>
    %cst_22 = arith.constant dense<0.000000e+00> : vector<1x128xf32>
    %55 = tpu.matmul %53#0, %54, %cst_22 {dimension_numbers = #tpu.dot_dimension_numbers<[1], [0], [0], [1], [0, 0, 1, 1], [], []>} : vector<1x256xf32>, vector<256x128xf32>, vector<1x128xf32> -> vector<1x128xf32>
    %c0_23 = arith.constant 0 : index
    %c0_24 = arith.constant 0 : index
    %56 = vector.load %arg7[%c0_23, %c0_24] : memref<1x128xf32, #tpu.memory_space<vmem>>, vector<1x128xf32>
    %57 = arith.addf %55, %56 : vector<1x128xf32>
    %cst_25 = arith.constant 0.000000e+00 : f32
    %58 = vector.broadcast %cst_25 : f32 to vector<1x128xf32>
    %59 = arith.minimumf %57, %58 : vector<1x128xf32>
    %60 = math.exp %59 : vector<1x128xf32>
    %cst_26 = arith.constant 1.000000e+00 : f32
    %61 = vector.broadcast %cst_26 : f32 to vector<1x128xf32>
    %62 = arith.subf %60, %61 : vector<1x128xf32>
    %cst_27 = arith.constant 0.000000e+00 : f32
    %63 = vector.broadcast %cst_27 : f32 to vector<1x128xf32>
    %64 = arith.cmpf ogt, %57, %63 : vector<1x128xf32>
    %65 = arith.select %64, %57, %62 : vector<1x128xi1>, vector<1x128xf32>
    %c0_28 = arith.constant 0 : index
    %c0_29 = arith.constant 0 : index
    %66 = vector.load %arg8[%c0_28, %c0_29] : memref<1x128xf32, #tpu.memory_space<vmem>>, vector<1x128xf32>
    %67 = arith.mulf %65, %66 : vector<1x128xf32>
    %cst_30 = arith.constant dense<0.000000e+00> : vector<1xf32>
    %68 = vector.multi_reduction <add>, %67, %cst_30 [1] : vector<1x128xf32> to vector<1xf32>
    %69 = vector.shape_cast %68 : vector<1xf32> to vector<1x1xf32>
    %c0_31 = arith.constant 0 : index
    %c0_32 = arith.constant 0 : index
    %70 = vector.load %arg9[%c0_31, %c0_32] : memref<1x1xf32, #tpu.memory_space<vmem>>, vector<1x1xf32>
    %71 = arith.addf %69, %70 : vector<1x1xf32>
    %c0_33 = arith.constant 0 : index
    %c0_34 = arith.constant 0 : index
    %72 = vector.load %arg10[%c0_33, %c0_34] : memref<1x1xf32, #tpu.memory_space<vmem>>, vector<1x1xf32>
    tpu.vector_store %arg10[%c0_33, %c0_34], %71 {strides = array<i32>} : memref<1x1xf32, #tpu.memory_space<vmem>>, vector<1x1xf32>,
    return
  }
}

</mosaic_0001>

<bundles_post_ra>
// kernel: _forward_jit.1
= control target key start
LH: loop header
LB: loop body
LE: loop exit
PB: predicated region body
PF: predicated region fallthrough
CT: control target
= control target key end

     0   :  { %s3150_s0 = inlined_call_operand.<no memory space> [shape: s32[1], index: 0, kind: input, shape index: {}]   ;;  %s3151_s1 = inlined_call_operand.vmem [shape: s32[8,2], index: 1, kind: input, shape index: {}]   ;;  %s3152_s2 = inlined_call_operand.hbm [shape: f32[128,256], index: 2, kind: input, shape index: {}]   ;;  %s3153_s3 = inlined_call_operand.hbm [shape: f32[256,1024], index: 3, kind: input, shape index: {}]   ;;  %s3154_s4 = inlined_call_operand.hbm [shape: bf16[256,1024], index: 4, kind: input, shape index: {}]   ;;  %s3155_s5 = inlined_call_operand.vmem [shape: f32[1,1024], index: 5, kind: input, shape index: {}]   ;;  %s3156_s6 = inlined_call_operand.hbm [shape: f32[256,128], index: 6, kind: input, shape index: {}]   ;;  %s3157_s7 = inlined_call_operand.vmem [shape: f32[1,128], index: 7, kind: input, shape index: {}]   ;;  %s3158_s8 = inlined_call_operand.vmem [shape: f32[1,128], index: 8, kind: input, shape index: {}]   ;;  %s3159_s9 = inlined_call_operand.<no memory space> [shape: f32[1,1], index: 9, kind: input, shape index: {}]   ;;  %s3160_s10 = inlined_call_operand.hbm [shape: f32[1,1], index: 10, kind: output, shape index: {}]  }
   0x1   :  { %v16_v0 = vstv %s3159_s9 }
   0x2   :  { %17 = vst [vmem:[#allocation4] sm:$0x1] %v16_v0 }
   0x3   :  { %18 = vsyncpa [#allocation6], 0 }
   0x4   :  { %19 = vsyncpa [#allocation9], 0 }
   0x5   :  { %20 = vsyncpa [#allocation12], 0  ;;  %s43_s17 = sshll.u32 %s3153_s3, 4  ;;  %s44_s17 = int_to_ptr.hbm [resolvable:$true] %s43_s17 }
   0x6   :  { %21 = vsyncpa [#allocation7], 0  ;;  %s2902_s18 = smov [#allocation8]   ;;  %s30_s22 = sshll.u32 %s3152_s2, 4  ;;  %s31_s22 = int_to_ptr.hbm [resolvable:$true] %s30_s22 }
   0x7   :  { %s45_s19 = sshll.u32 %s2902_s18, 4  ;;  %s2903_s23 = smov 1024   ;;  %s46_s19 = int_to_ptr.vmem [resolvable:$true] %s45_s19 }
   0x8   :  { %s2904_s24 = smov 64   ;;  %s2905_s9 = smov [#allocation5]  }
   0x9   :  { %51 = dma.hbm_to_vmem [thread:$0]  %s44_s17, 32768, %s46_s19, [#allocation9], %s2903_s23, %s2903_s23, %s2904_s24  }
   0xa   :  { %s32_s25 = sshll.u32 %s2905_s9, 4  ;;  %s2906_s26 = smov 256   ;;  %s33_s25 = int_to_ptr.vmem [resolvable:$true] %s32_s25 }
   0xb   :  { %s2907_s27 = smov 16   ;;  %s56_s29 = sshll.u32 %s3154_s4, 4  ;;  %s57_s29 = int_to_ptr.hbm [resolvable:$true] %s56_s29 }
   0xc   :  { %38 = dma.hbm_to_vmem [thread:$0]  %s31_s22, 4096, %s33_s25, [#allocation6], %s2906_s26, %s2906_s26, %s2907_s27  }
   0xd   :  { %s2908_s30 = smov [#allocation10]   ;;  %s71_s13 = sshll.u32 %s3156_s6, 4  ;;  %s72_s13 = int_to_ptr.hbm [resolvable:$true] %s71_s13 }
   0xe   :  { %s58_s11 = sshll.u32 %s2908_s30, 4  ;;  %s2909_s14 = smov 512   ;;  %s59_s11 = int_to_ptr.vmem [resolvable:$true] %s58_s11 }
   0xf   :  { %s2910_s15 = smov 32   ;;  %s2911_s16 = smov [#allocation11]  }
  0x10   :  { %64 = dma.hbm_to_vmem [thread:$0]  %s57_s29, 16384, %s59_s11, [#allocation9], %s2909_s14, %s2909_s14, %s2910_s15  }
  0x11   :  { %s73_s17 = sshll.u32 %s2911_s16, 4  ;;  %s2912_s18 = smov 128   ;;  %s74_s17 = int_to_ptr.vmem [resolvable:$true] %s73_s17 }
  0x12   :  { %s2913_s19 = smov 8  }
  0x13   :  { %79 = dma.hbm_to_vmem [thread:$0]  %s72_s13, 4096, %s74_s17, [#allocation12], %s2912_s18, %s2912_s18, %s2913_s19  }
  0x14   :  { %2878 = dma.done.wait [#allocation6], 4096  }
  0x15   :  { %2879 = vsyncadd [#allocation6], 4294963200 }
  0x16   :  { %2880 = dma.done.wait [#allocation9], 49152  }
  0x17   :  { %2881 = vsyncadd [#allocation9], 4294918144 }
  0x18   :  { %2882 = dma.done.wait [#allocation12], 4096  }
  0x19   :  { %2883 = vsyncadd [#allocation12], 4294963200  ;;  %v2914_v1 = vmov 0   ;;  %v2994_v2 = vld [vmem:[%s3151_s1] sm:$0xff]  ;;  %v142_v3 = vld [vmem:[#allocation5 + $0xf0] sm:$0xff]  ;;  %s2915_s1 = smov 1  }
  0x1a   :  { %2727 = vset.pattern.permute.xlu0 %v2914_v1  ;;  %v143_v4 = vld [vmem:[#allocation5 + $0xf8] sm:$0xff]  ;;  %144 = vmatpush.msra.mxu0 %v142_v3  ;;  %v140_v5 = vld [vmem:[#allocation5 + $0xe0] sm:$0xff]  ;;  %v141_v6 = vld [vmem:[#allocation5 + $0xe8] sm:$0xff]  ;;  %v195_v10 = vcvt.s32.f32 %v2994_v2  ;;  %vm184_vm0 = vcmp.eq.s32.totalorder %v2994_v2, 0  ;;  %v2916_v36 = vmov 1   ;;  %vm185_vm1 = vcmp.eq.s32.totalorder %v2994_v2, 1 }
  0x1b   :  { %107 = vperm.xlu0 %2727, %v2994_v2   ;;  %164 = vmatpush.msra.mxu1 %v143_v4  ;;  %v138_v7 = vld [vmem:[#allocation5 + $0xd0] sm:$0xff]  ;;  %v139_v8 = vld [vmem:[#allocation5 + $0xd8] sm:$0xff]  ;;  %v136_v9 = vld [vmem:[#allocation5 + $0xc0] sm:$0xff]  ;;  %v186_v37 = vsel %vm184_vm0, 1, %v2914_v1  ;;  %p2032_p0 = scmp.le.s32.totalorder %s3150_s0, 0 }
  0x1c   :  { %145 = vmatpush.msra.mxu0 %v140_v5  ;;  %v137_v11 = vld [vmem:[#allocation5 + $0xc8] sm:$0xff]  ;;  %v134_v12 = vld [vmem:[#allocation5 + $0xb0] sm:$0xff]  ;;  %v135_v13 = vld [vmem:[#allocation5 + $0xb8] sm:$0xff]  ;;  %2728 = vset.pattern.permute.xlu1 %v2916_v36  ;;  %s3088_s9 = smov (!%p2032_p0), 0  }
  0x1d   :  { %165 = vmatpush.msra.mxu1 %v141_v6  ;;  %v132_v14 = vld [vmem:[#allocation5 + $0xa0] sm:$0xff]  ;;  %v133_v15 = vld [vmem:[#allocation5 + $0xa8] sm:$0xff]  ;;  %v130_v16 = vld [vmem:[#allocation5 + $0x90] sm:$0xff]  ;;  %188 = vperm.xlu1 %2728, %v186_v37   ;;  %v2918_v37 = vmov 0.0  }
  0x1e   :  { %146 = vmatpush.msra.mxu0 %v138_v7  ;;  %v131_v17 = vld [vmem:[#allocation5 + $0x98] sm:$0xff]  ;;  %v128_v18 = vld [vmem:[#allocation5 + $0x80] sm:$0xff]  ;;  %v129_v19 = vld [vmem:[#allocation5 + $0x88] sm:$0xff] }
  0x1f   :  { %166 = vmatpush.msra.mxu1 %v139_v8  ;;  %v126_v20 = vld [vmem:[#allocation5 + $0x70] sm:$0xff]  ;;  %v127_v21 = vld [vmem:[#allocation5 + $0x78] sm:$0xff]  ;;  %v124_v22 = vld [vmem:[#allocation5 + $0x60] sm:$0xff] }
  0x20   :  { %147 = vmatpush.msra.mxu0 %v136_v9  ;;  %v125_v23 = vld [vmem:[#allocation5 + $0x68] sm:$0xff]  ;;  %v122_v24 = vld [vmem:[#allocation5 + $0x50] sm:$0xff]  ;;  %v123_v25 = vld [vmem:[#allocation5 + $0x58] sm:$0xff]  ;;  %v104_v9 = vlaneseq }
  0x21   :  { %167 = vmatpush.msra.mxu1 %v137_v11  ;;  %v120_v26 = vld [vmem:[#allocation5 + $0x40] sm:$0xff]  ;;  %v121_v27 = vld [vmem:[#allocation5 + $0x48] sm:$0xff]  ;;  %v118_v28 = vld [vmem:[#allocation5 + $0x30] sm:$0xff] }
  0x22   :  { %148 = vmatpush.msra.mxu0 %v134_v12  ;;  %v119_v29 = vld [vmem:[#allocation5 + $0x38] sm:$0xff]  ;;  %v116_v30 = vld [vmem:[#allocation5 + $0x20] sm:$0xff]  ;;  %v117_v31 = vld [vmem:[#allocation5 + $0x28] sm:$0xff] }
  0x23   :  { %197 = vrot.lane.b32.xlu0 %v195_v10, %s2915_s1  ;;  %168 = vmatpush.msra.mxu1 %v135_v13  ;;  %v114_v32 = vld [vmem:[#allocation5 + $0x10] sm:$0xff]  ;;  %v115_v33 = vld [vmem:[#allocation5 + $0x18] sm:$0xff]  ;;  %v112_v34 = vld [vmem:[#allocation5] sm:$0xff] }
  0x24   :  { %149 = vmatpush.msra.mxu0 %v132_v14  ;;  %v113_v35 = vld [vmem:[#allocation5 + $0x8] sm:$0xff]  ;;  %2729 = vset.pattern.permute.xlu0 %v2916_v36  ;;  %v345_v38 = vld [vmem:[#allocation8 + $0x3c0] sm:$0xff]  ;;  %vm193_vm3 = vmor %vm184_vm0, %vm185_vm1 }
  0x25   :  { %169 = vmatpush.msra.mxu1 %v133_v15  ;;  %v473_v39 = vld [vmem:[#allocation8 + $0x7c0] sm:$0xff]  ;;  %v346_v40 = vld [vmem:[#allocation8 + $0x3c8] sm:$0xff]  ;;  %499 = vmatpush.msra.mxu2 %v345_v38  ;;  %v194_v38 = vsel %vm193_vm3, -1.0, %v2918_v37  ;;  %v468_v2 = vld [vmem:[#allocation8 + $0x798] sm:$0xff] }
  0x26   :  { %150 = vmatpush.msra.mxu0 %v130_v16  ;;  %519 = vmatpush.msra.mxu3 %v473_v39  ;;  %v474_v41 = vld [vmem:[#allocation8 + $0x7c8] sm:$0xff]  ;;  %v337_v42 = vld [vmem:[#allocation8 + $0x380] sm:$0xff] }
  0x27   :  { %170 = vmatpush.msra.mxu1 %v131_v17  ;;  %v465_v43 = vld [vmem:[#allocation8 + $0x780] sm:$0xff]  ;;  %v338_v44 = vld [vmem:[#allocation8 + $0x388] sm:$0xff]  ;;  %500 = vmatpush.msra.mxu2 %v337_v42 }
  0x28   :  { %151 = vmatpush.msra.mxu0 %v128_v18  ;;  %v466_v45 = vld [vmem:[#allocation8 + $0x788] sm:$0xff]  ;;  %v329_v46 = vld [vmem:[#allocation8 + $0x340] sm:$0xff]  ;;  %520 = vmatpush.msra.mxu3 %v465_v43  ;;  %v3003_v18 = vand.u32 127, %v104_v9 }
  0x29   :  { %171 = vmatpush.msra.mxu1 %v129_v19  ;;  %v457_v47 = vld [vmem:[#allocation8 + $0x740] sm:$0xff]  ;;  %v330_v48 = vld [vmem:[#allocation8 + $0x348] sm:$0xff]  ;;  %501 = vmatpush.msra.mxu2 %v329_v46 }
  0x2a   :  { %152 = vmatpush.msra.mxu0 %v126_v20  ;;  %v458_v49 = vld [vmem:[#allocation8 + $0x748] sm:$0xff]  ;;  %v321_v50 = vld [vmem:[#allocation8 + $0x300] sm:$0xff]  ;;  %521 = vmatpush.msra.mxu3 %v457_v47  ;;  %v347_v47 = vld [vmem:[#allocation8 + $0x3d0] sm:$0xff] }
  0x2b   :  { %172 = vmatpush.msra.mxu1 %v127_v21  ;;  %v449_v51 = vld [vmem:[#allocation8 + $0x700] sm:$0xff]  ;;  %v322_v52 = vld [vmem:[#allocation8 + $0x308] sm:$0xff]  ;;  %502 = vmatpush.msra.mxu2 %v321_v50  ;;  %v476_v50 = vld [vmem:[#allocation8 + $0x7d8] sm:$0xff] }
  0x2c   :  { %153 = vmatpush.msra.mxu0 %v124_v22  ;;  %v450_v53 = vld [vmem:[#allocation8 + $0x708] sm:$0xff]  ;;  %v313_v54 = vld [vmem:[#allocation8 + $0x2c0] sm:$0xff]  ;;  %522 = vmatpush.msra.mxu3 %v449_v51  ;;  %v339_v51 = vld [vmem:[#allocation8 + $0x390] sm:$0xff] }
  0x2d   :  { %173 = vmatpush.msra.mxu1 %v125_v23  ;;  %v441_v55 = vld [vmem:[#allocation8 + $0x6c0] sm:$0xff]  ;;  %v314_v56 = vld [vmem:[#allocation8 + $0x2c8] sm:$0xff]  ;;  %503 = vmatpush.msra.mxu2 %v313_v54  ;;  %v331_v54 = vld [vmem:[#allocation8 + $0x350] sm:$0xff] }
  0x2e   :  { %154 = vmatpush.msra.mxu0 %v122_v24  ;;  %v442_v57 = vld [vmem:[#allocation8 + $0x6c8] sm:$0xff]  ;;  %v305_v58 = vld [vmem:[#allocation8 + $0x280] sm:$0xff]  ;;  %523 = vmatpush.msra.mxu3 %v441_v55  ;;  %v459_v55 = vld [vmem:[#allocation8 + $0x750] sm:$0xff] }
  0x2f   :  { %174 = vmatpush.msra.mxu1 %v123_v25  ;;  %v433_v59 = vld [vmem:[#allocation8 + $0x680] sm:$0xff]  ;;  %v306_v60 = vld [vmem:[#allocation8 + $0x288] sm:$0xff]  ;;  %504 = vmatpush.msra.mxu2 %v305_v58  ;;  %v323_v58 = vld [vmem:[#allocation8 + $0x310] sm:$0xff] }
  0x30   :  { %155 = vmatpush.msra.mxu0 %v120_v26  ;;  %v434_v61 = vld [vmem:[#allocation8 + $0x688] sm:$0xff]  ;;  %v297_v62 = vld [vmem:[#allocation8 + $0x240] sm:$0xff]  ;;  %524 = vmatpush.msra.mxu3 %v433_v59  ;;  %v451_v59 = vld [vmem:[#allocation8 + $0x710] sm:$0xff] }
  0x31   :  { %175 = vmatpush.msra.mxu1 %v121_v27  ;;  %v425_v63 = vld [vmem:[#allocation8 + $0x640] sm:$0xff]  ;;  %v298_v0 = vld [vmem:[#allocation8 + $0x248] sm:$0xff]  ;;  %505 = vmatpush.msra.mxu2 %v297_v62  ;;  %v315_v62 = vld [vmem:[#allocation8 + $0x2d0] sm:$0xff] }
  0x32   :  { %156 = vmatpush.msra.mxu0 %v118_v28  ;;  %v426_v1 = vld [vmem:[#allocation8 + $0x648] sm:$0xff]  ;;  %v289_v3 = vld [vmem:[#allocation8 + $0x200] sm:$0xff]  ;;  %525 = vmatpush.msra.mxu3 %v425_v63  ;;  %v2917_v28 = vmov 1.0   ;;  %v443_v63 = vld [vmem:[#allocation8 + $0x6d0] sm:$0xff] }
  0x33   :  { %176 = vmatpush.msra.mxu1 %v119_v29  ;;  %v417_v4 = vld [vmem:[#allocation8 + $0x600] sm:$0xff]  ;;  %v290_v5 = vld [vmem:[#allocation8 + $0x208] sm:$0xff]  ;;  %506 = vmatpush.msra.mxu2 %v289_v3  ;;  %v307_v3 = vld [vmem:[#allocation8 + $0x290] sm:$0xff] }
  0x34   :  { %157 = vmatpush.msra.mxu0 %v116_v30  ;;  %v418_v6 = vld [vmem:[#allocation8 + $0x608] sm:$0xff]  ;;  %v281_v7 = vld [vmem:[#allocation8 + $0x1c0] sm:$0xff]  ;;  %526 = vmatpush.msra.mxu3 %v417_v4  ;;  %v435_v4 = vld [vmem:[#allocation8 + $0x690] sm:$0xff] }
  0x35   :  { %177 = vmatpush.msra.mxu1 %v117_v31  ;;  %v409_v8 = vld [vmem:[#allocation8 + $0x5c0] sm:$0xff]  ;;  %v282_v10 = vld [vmem:[#allocation8 + $0x1c8] sm:$0xff]  ;;  %507 = vmatpush.msra.mxu2 %v281_v7  ;;  %v299_v7 = vld [vmem:[#allocation8 + $0x250] sm:$0xff] }
  0x36   :  { %158 = vmatpush.msra.mxu0 %v114_v32  ;;  %v410_v11 = vld [vmem:[#allocation8 + $0x5c8] sm:$0xff]  ;;  %v273_v12 = vld [vmem:[#allocation8 + $0x180] sm:$0xff]  ;;  %527 = vmatpush.msra.mxu3 %v409_v8  ;;  %v427_v8 = vld [vmem:[#allocation8 + $0x650] sm:$0xff] }
  0x37   :  { %178 = vmatpush.msra.mxu1 %v115_v33  ;;  %v401_v13 = vld [vmem:[#allocation8 + $0x580] sm:$0xff]  ;;  %v274_v14 = vld [vmem:[#allocation8 + $0x188] sm:$0xff]  ;;  %508 = vmatpush.msra.mxu2 %v273_v12  ;;  %v291_v12 = vld [vmem:[#allocation8 + $0x210] sm:$0xff] }
  0x38   :  { %159 = vmatpush.msra.mxu0 %v112_v34  ;;  %v402_v15 = vld [vmem:[#allocation8 + $0x588] sm:$0xff]  ;;  %v265_v16 = vld [vmem:[#allocation8 + $0x140] sm:$0xff]  ;;  %528 = vmatpush.msra.mxu3 %v401_v13  ;;  %v419_v13 = vld [vmem:[#allocation8 + $0x610] sm:$0xff] }
  0x39   :  { %179 = vmatpush.msra.mxu1 %v113_v35  ;;  %v393_v17 = vld [vmem:[#allocation8 + $0x540] sm:$0xff]  ;;  %v266_v19 = vld [vmem:[#allocation8 + $0x148] sm:$0xff]  ;;  %509 = vmatpush.msra.mxu2 %v265_v16  ;;  %v283_v16 = vld [vmem:[#allocation8 + $0x1d0] sm:$0xff] }
  0x3a   :  { %539 = vmatpush.msrb.mxu0 %v346_v40  ;;  %v394_v20 = vld [vmem:[#allocation8 + $0x548] sm:$0xff]  ;;  %v257_v21 = vld [vmem:[#allocation8 + $0x100] sm:$0xff]  ;;  %529 = vmatpush.msra.mxu3 %v393_v17  ;;  %v411_v17 = vld [vmem:[#allocation8 + $0x5d0] sm:$0xff] }
  0x3b   :  { %559 = vmatpush.msrb.mxu1 %v474_v41  ;;  %v385_v22 = vld [vmem:[#allocation8 + $0x500] sm:$0xff]  ;;  %v258_v24 = vld [vmem:[#allocation8 + $0x108] sm:$0xff]  ;;  %510 = vmatpush.msra.mxu2 %v257_v21  ;;  %v275_v21 = vld [vmem:[#allocation8 + $0x190] sm:$0xff] }
  0x3c   :  { %540 = vmatpush.msrb.mxu0 %v338_v44  ;;  %v386_v25 = vld [vmem:[#allocation8 + $0x508] sm:$0xff]  ;;  %530 = vmatpush.msra.mxu3 %v385_v22  ;;  %v249_v26 = vld [vmem:[#allocation8 + $0xc0] sm:$0xff]  ;;  %v403_v22 = vld [vmem:[#allocation8 + $0x590] sm:$0xff] }
  0x3d   :  { %560 = vmatpush.msrb.mxu1 %v466_v45  ;;  %v377_v27 = vld [vmem:[#allocation8 + $0x4c0] sm:$0xff]  ;;  %v250_v29 = vld [vmem:[#allocation8 + $0xc8] sm:$0xff]  ;;  %511 = vmatpush.msra.mxu2 %v249_v26  ;;  %v395_v26 = vld [vmem:[#allocation8 + $0x550] sm:$0xff] }
  0x3e   :  { %541 = vmatpush.msrb.mxu0 %v330_v48  ;;  %v378_v30 = vld [vmem:[#allocation8 + $0x4c8] sm:$0xff]  ;;  %v241_v31 = vld [vmem:[#allocation8 + $0x80] sm:$0xff]  ;;  %531 = vmatpush.msra.mxu3 %v377_v27  ;;  %v475_v48 = vld [vmem:[#allocation8 + $0x7d0] sm:$0xff] }
  0x3f   :  { %561 = vmatpush.msrb.mxu1 %v458_v49  ;;  %v369_v32 = vld [vmem:[#allocation8 + $0x480] sm:$0xff]  ;;  %v242_v33 = vld [vmem:[#allocation8 + $0x88] sm:$0xff]  ;;  %512 = vmatpush.msra.mxu2 %v241_v31  ;;  %v348_v49 = vld [vmem:[#allocation8 + $0x3d8] sm:$0xff] }
  0x40   :  { %542 = vmatpush.msrb.mxu0 %v322_v52  ;;  %v370_v34 = vld [vmem:[#allocation8 + $0x488] sm:$0xff]  ;;  %v233_v35 = vld [vmem:[#allocation8 + $0x40] sm:$0xff]  ;;  %532 = vmatpush.msra.mxu3 %v369_v32  ;;  %v467_v52 = vld [vmem:[#allocation8 + $0x790] sm:$0xff] }
  0x41   :  { %562 = vmatpush.msrb.mxu1 %v450_v53  ;;  %v361_v36 = vld [vmem:[#allocation8 + $0x440] sm:$0xff]  ;;  %v234_v39 = vld [vmem:[#allocation8 + $0x48] sm:$0xff]  ;;  %513 = vmatpush.msra.mxu2 %v233_v35  ;;  %v340_v53 = vld [vmem:[#allocation8 + $0x398] sm:$0xff] }
  0x42   :  { %543 = vmatpush.msrb.mxu0 %v314_v56  ;;  %v362_v40 = vld [vmem:[#allocation8 + $0x448] sm:$0xff]  ;;  %v225_v41 = vld [vmem:[#allocation8] sm:$0xff]  ;;  %533 = vmatpush.msra.mxu3 %v361_v36  ;;  %v332_v56 = vld [vmem:[#allocation8 + $0x358] sm:$0xff] }
  0x43   :  { %563 = vmatpush.msrb.mxu1 %v442_v57  ;;  %v353_v43 = vld [vmem:[#allocation8 + $0x400] sm:$0xff]  ;;  %v226_v44 = vld [vmem:[#allocation8 + $0x8] sm:$0xff]  ;;  %514 = vmatpush.msra.mxu2 %v225_v41  ;;  %v460_v57 = vld [vmem:[#allocation8 + $0x758] sm:$0xff] }
  0x44   :  { %544 = vmatpush.msrb.mxu0 %v306_v60  ;;  %v354_v46 = vld [vmem:[#allocation8 + $0x408] sm:$0xff]  ;;  %534 = vmatpush.msra.mxu3 %v353_v43  ;;  %v324_v60 = vld [vmem:[#allocation8 + $0x318] sm:$0xff]  ;;  %v363_v43 = vld [vmem:[#allocation8 + $0x450] sm:$0xff] }
  0x45   :  { %564 = vmatpush.msrb.mxu1 %v434_v61  ;;  %579 = vmatpush.msrb.mxu2 %v347_v47  ;;  %v452_v61 = vld [vmem:[#allocation8 + $0x718] sm:$0xff]  ;;  %v355_v47 = vld [vmem:[#allocation8 + $0x410] sm:$0xff] }
  0x46   :  { %545 = vmatpush.msrb.mxu0 %v298_v0  ;;  %599 = vmatpush.msrb.mxu3 %v475_v48  ;;  %v316_v0 = vld [vmem:[#allocation8 + $0x2d8] sm:$0xff] }
  0x47   :  { %565 = vmatpush.msrb.mxu1 %v426_v1  ;;  %580 = vmatpush.msrb.mxu2 %v339_v51  ;;  %v444_v1 = vld [vmem:[#allocation8 + $0x6d8] sm:$0xff]  ;;  %v201_v51 = vadd.s32 128, %v3003_v18 }
  0x48   :  { %546 = vmatpush.msrb.mxu0 %v290_v5  ;;  %600 = vmatpush.msrb.mxu3 %v467_v52  ;;  %v308_v5 = vld [vmem:[#allocation8 + $0x298] sm:$0xff]  ;;  %v218_v52 = vshrl.u32 %v104_v9, 7 }
  0x49   :  { %566 = vmatpush.msrb.mxu1 %v418_v6  ;;  %581 = vmatpush.msrb.mxu2 %v331_v54  ;;  %v436_v6 = vld [vmem:[#allocation8 + $0x698] sm:$0xff]  ;;  %vm203_vm4 = vcmp.eq.s32.totalorder %v201_v51, 179  ;;  %v219_v54 = vstv %s3150_s0  ;;  %v254_v51 = vld [vmem:[#allocation8 + $0xe8] sm:$0xff] }
  0x4a   :  { %547 = vmatpush.msrb.mxu0 %v282_v10  ;;  %601 = vmatpush.msrb.mxu3 %v459_v55  ;;  %v300_v10 = vld [vmem:[#allocation8 + $0x258] sm:$0xff]  ;;  %vm3020_vm6 = vcmp.lt.s32.totalorder %v218_v52, %v219_v54  ;;  %v382_v52 = vld [vmem:[#allocation8 + $0x4e8] sm:$0xff] }
  0x4b   :  { %567 = vmatpush.msrb.mxu1 %v410_v11  ;;  %582 = vmatpush.msrb.mxu2 %v323_v58  ;;  %v428_v11 = vld [vmem:[#allocation8 + $0x658] sm:$0xff]  ;;  %v246_v54 = vld [vmem:[#allocation8 + $0xa8] sm:$0xff] }
  0x4c   :  { %548 = vmatpush.msrb.mxu0 %v274_v14  ;;  %602 = vmatpush.msrb.mxu3 %v451_v59  ;;  %v292_v14 = vld [vmem:[#allocation8 + $0x218] sm:$0xff] }
  0x4d   :  { %568 = vmatpush.msrb.mxu1 %v402_v15  ;;  %583 = vmatpush.msrb.mxu2 %v315_v62  ;;  %v420_v15 = vld [vmem:[#allocation8 + $0x618] sm:$0xff]  ;;  %v477_v62 = vld [vmem:[#allocation8 + $0x7e0] sm:$0xff] }
  0x4e   :  { %549 = vmatpush.msrb.mxu0 %v266_v19  ;;  %603 = vmatpush.msrb.mxu3 %v443_v63  ;;  %v284_v19 = vld [vmem:[#allocation8 + $0x1d8] sm:$0xff]  ;;  %v350_v63 = vld [vmem:[#allocation8 + $0x3e8] sm:$0xff] }
  0x4f   :  { %569 = vmatpush.msrb.mxu1 %v394_v20  ;;  %584 = vmatpush.msrb.mxu2 %v307_v3  ;;  %v412_v20 = vld [vmem:[#allocation8 + $0x5d8] sm:$0xff]  ;;  %v469_v3 = vld [vmem:[#allocation8 + $0x7a0] sm:$0xff] }
  0x50   :  { %550 = vmatpush.msrb.mxu0 %v258_v24  ;;  %604 = vmatpush.msrb.mxu3 %v435_v4  ;;  %v404_v24 = vld [vmem:[#allocation8 + $0x598] sm:$0xff]  ;;  %v342_v4 = vld [vmem:[#allocation8 + $0x3a8] sm:$0xff] }
  0x51   :  { %570 = vmatpush.msrb.mxu1 %v386_v25  ;;  %585 = vmatpush.msrb.mxu2 %v299_v7  ;;  %v267_v25 = vld [vmem:[#allocation8 + $0x150] sm:$0xff]  ;;  %v268_v27 = vld [vmem:[#allocation8 + $0x158] sm:$0xff]  ;;  %v461_v7 = vld [vmem:[#allocation8 + $0x760] sm:$0xff] }
  0x52   :  { %551 = vmatpush.msrb.mxu0 %v250_v29  ;;  %605 = vmatpush.msrb.mxu3 %v427_v8  ;;  %v259_v29 = vld [vmem:[#allocation8 + $0x110] sm:$0xff]  ;;  %v260_v31 = vld [vmem:[#allocation8 + $0x118] sm:$0xff]  ;;  %v334_v8 = vld [vmem:[#allocation8 + $0x368] sm:$0xff] }
  0x53   :  { %571 = vmatpush.msrb.mxu1 %v378_v30  ;;  %586 = vmatpush.msrb.mxu2 %v291_v12  ;;  %v387_v30 = vld [vmem:[#allocation8 + $0x510] sm:$0xff]  ;;  %v388_v32 = vld [vmem:[#allocation8 + $0x518] sm:$0xff]  ;;  %v453_v12 = vld [vmem:[#allocation8 + $0x720] sm:$0xff] }
  0x54   :  { %552 = vmatpush.msrb.mxu0 %v242_v33  ;;  %606 = vmatpush.msrb.mxu3 %v419_v13  ;;  %v251_v33 = vld [vmem:[#allocation8 + $0xd0] sm:$0xff]  ;;  %v252_v35 = vld [vmem:[#allocation8 + $0xd8] sm:$0xff]  ;;  %v326_v13 = vld [vmem:[#allocation8 + $0x328] sm:$0xff] }
  0x55   :  { %572 = vmatpush.msrb.mxu1 %v370_v34  ;;  %587 = vmatpush.msrb.mxu2 %v283_v16  ;;  %v379_v34 = vld [vmem:[#allocation8 + $0x4d0] sm:$0xff]  ;;  %v380_v36 = vld [vmem:[#allocation8 + $0x4d8] sm:$0xff]  ;;  %v445_v16 = vld [vmem:[#allocation8 + $0x6e0] sm:$0xff] }
  0x56   :  { %553 = vmatpush.msrb.mxu0 %v234_v39  ;;  %607 = vmatpush.msrb.mxu3 %v411_v17  ;;  %v371_v39 = vld [vmem:[#allocation8 + $0x490] sm:$0xff]  ;;  %v372_v41 = vld [vmem:[#allocation8 + $0x498] sm:$0xff]  ;;  %v318_v17 = vld [vmem:[#allocation8 + $0x2e8] sm:$0xff] }
  0x57   :  { %573 = vmatpush.msrb.mxu1 %v362_v40  ;;  %588 = vmatpush.msrb.mxu2 %v275_v21  ;;  %v244_v40 = vld [vmem:[#allocation8 + $0x98] sm:$0xff]  ;;  %v437_v21 = vld [vmem:[#allocation8 + $0x6a0] sm:$0xff] }
  0x58   :  { %554 = vmatpush.msrb.mxu0 %v226_v44  ;;  %608 = vmatpush.msrb.mxu3 %v403_v22  ;;  %v236_v44 = vld [vmem:[#allocation8 + $0x58] sm:$0xff]  ;;  %v310_v22 = vld [vmem:[#allocation8 + $0x2a8] sm:$0xff] }
  0x59   :  { %574 = vmatpush.msrb.mxu1 %v354_v46  ;;  %589 = vmatpush.msrb.mxu2 %v267_v25  ;;  %v227_v46 = vld [vmem:[#allocation8 + $0x10] sm:$0xff]  ;;  %v228_v48 = vld [vmem:[#allocation8 + $0x18] sm:$0xff]  ;;  %v429_v25 = vld [vmem:[#allocation8 + $0x660] sm:$0xff] }
  0x5a   :  { %609 = vmatpush.msrb.mxu3 %v395_v26  ;;  %v302_v26 = vld [vmem:[#allocation8 + $0x268] sm:$0xff] }
  0x5b   :  { %590 = vmatpush.msrb.mxu2 %v259_v29  ;;  %v421_v29 = vld [vmem:[#allocation8 + $0x620] sm:$0xff] }
  0x5c   :  { %610 = vmatpush.msrb.mxu3 %v387_v30  ;;  %v294_v30 = vld [vmem:[#allocation8 + $0x228] sm:$0xff] }
  0x5d   :  { %591 = vmatpush.msrb.mxu2 %v251_v33  ;;  %v413_v33 = vld [vmem:[#allocation8 + $0x5e0] sm:$0xff] }
  0x5e   :  { %611 = vmatpush.msrb.mxu3 %v379_v34  ;;  %v286_v34 = vld [vmem:[#allocation8 + $0x1e8] sm:$0xff] }
  0x60   :  { %612 = vmatpush.msrb.mxu3 %v371_v39  ;;  %v278_v39 = vld [vmem:[#allocation8 + $0x1a8] sm:$0xff] }
  0x62   :  { %613 = vmatpush.msrb.mxu3 %v363_v43  ;;  %v270_v43 = vld [vmem:[#allocation8 + $0x168] sm:$0xff] }
  0x64   :  { %614 = vmatpush.msrb.mxu3 %v355_v47  ;;  %v262_v47 = vld [vmem:[#allocation8 + $0x128] sm:$0xff] }
  0x8d   :  { %v108_v23 = vpop.permute.xlu0 %107 }
  0x8e   :  { %vm109_vm2 = vcmp.eq.s32.totalorder %v3003_v18, %v108_v23  ;;  %v276_v23 = vld [vmem:[#allocation8 + $0x198] sm:$0xff] }
  0x8f   :  { %2013 = vmatmul.msk.f32.vlgmr.msra.gmra.mxu0 %vm109_vm2, %v2917_v28  ;;  %2014 = vmatmul.msk.f32.vlgmr.msra.gmra.mxu1 %vm109_vm2, %v2917_v28  ;;  %v396_v28 = vld [vmem:[#allocation8 + $0x558] sm:$0xff] }
  0x90   :  { %619 = vmatpush.msra.mxu0 %v348_v49  ;;  %639 = vmatpush.msra.mxu1 %v476_v50  ;;  %v356_v49 = vld [vmem:[#allocation8 + $0x418] sm:$0xff]  ;;  %v189_v50 = vpop.permute.xlu1 %188 }
  0x91   :  { %vm190_vm5 = vcmp.eq.s32.totalorder %v189_v50, 1  ;;  %v381_v50 = vld [vmem:[#allocation8 + $0x4e0] sm:$0xff] }
  0x92   :  { %620 = vmatpush.msra.mxu0 %v340_v53  ;;  %640 = vmatpush.msra.mxu1 %v468_v2  ;;  %v2015_v53 = vsel %vm203_vm4, 1.0, %v2918_v37  ;;  %v349_v37 = vld [vmem:[#allocation8 + $0x3e0] sm:$0xff] }
  0x94   :  { %621 = vmatpush.msra.mxu0 %v332_v56  ;;  %641 = vmatpush.msra.mxu1 %v460_v57 }
  0x95   :  { %v198_v42 = vpop.permute.xlu0 %197 }
  0x96   :  { %v200_v45 = vsel %vm185_vm1, %v198_v42, %v194_v38  ;;  %622 = vmatpush.msra.mxu0 %v324_v60  ;;  %642 = vmatpush.msra.mxu1 %v452_v61  ;;  %v243_v38 = vld [vmem:[#allocation8 + $0x90] sm:$0xff] }
  0x97   :  { %210 = vperm.xlu1 %2728, %v200_v45   ;;  %592 = vmatpush.msrb.mxu2 %v243_v38  ;;  %v235_v42 = vld [vmem:[#allocation8 + $0x50] sm:$0xff]  ;;  %v364_v45 = vld [vmem:[#allocation8 + $0x458] sm:$0xff]  ;;  %v405_v38 = vld [vmem:[#allocation8 + $0x5a0] sm:$0xff] }
  0x98   :  { %623 = vmatpush.msra.mxu0 %v316_v0  ;;  %643 = vmatpush.msra.mxu1 %v444_v1  ;;  %v478_v0 = vld [vmem:[#allocation8 + $0x7e8] sm:$0xff]  ;;  %v341_v1 = vld [vmem:[#allocation8 + $0x3a0] sm:$0xff] }
  0x99   :  { %593 = vmatpush.msrb.mxu2 %v235_v42  ;;  %v397_v42 = vld [vmem:[#allocation8 + $0x560] sm:$0xff] }
  0x9a   :  { %624 = vmatpush.msra.mxu0 %v308_v5  ;;  %644 = vmatpush.msra.mxu1 %v436_v6  ;;  %v470_v5 = vld [vmem:[#allocation8 + $0x7a8] sm:$0xff]  ;;  %v333_v6 = vld [vmem:[#allocation8 + $0x360] sm:$0xff] }
  0x9b   :  { %594 = vmatpush.msrb.mxu2 %v227_v46  ;;  %v389_v46 = vld [vmem:[#allocation8 + $0x520] sm:$0xff] }
  0x9c   :  { %625 = vmatpush.msra.mxu0 %v300_v10  ;;  %645 = vmatpush.msra.mxu1 %v428_v11  ;;  %v462_v10 = vld [vmem:[#allocation8 + $0x768] sm:$0xff]  ;;  %v325_v11 = vld [vmem:[#allocation8 + $0x320] sm:$0xff] }
  0x9e   :  { %626 = vmatpush.msra.mxu0 %v292_v14  ;;  %646 = vmatpush.msra.mxu1 %v420_v15  ;;  %v454_v14 = vld [vmem:[#allocation8 + $0x728] sm:$0xff]  ;;  %v317_v15 = vld [vmem:[#allocation8 + $0x2e0] sm:$0xff] }
  0xa0   :  { %627 = vmatpush.msra.mxu0 %v284_v19  ;;  %647 = vmatpush.msra.mxu1 %v412_v20  ;;  %v446_v19 = vld [vmem:[#allocation8 + $0x6e8] sm:$0xff]  ;;  %v309_v20 = vld [vmem:[#allocation8 + $0x2a0] sm:$0xff] }
  0xa2   :  { %628 = vmatpush.msra.mxu0 %v276_v23  ;;  %648 = vmatpush.msra.mxu1 %v404_v24  ;;  %v438_v23 = vld [vmem:[#allocation8 + $0x6a8] sm:$0xff]  ;;  %v301_v24 = vld [vmem:[#allocation8 + $0x260] sm:$0xff] }
  0xa4   :  { %629 = vmatpush.msra.mxu0 %v268_v27  ;;  %649 = vmatpush.msra.mxu1 %v396_v28  ;;  %v430_v27 = vld [vmem:[#allocation8 + $0x668] sm:$0xff]  ;;  %v293_v28 = vld [vmem:[#allocation8 + $0x220] sm:$0xff] }
  0xa6   :  { %630 = vmatpush.msra.mxu0 %v260_v31  ;;  %650 = vmatpush.msra.mxu1 %v388_v32  ;;  %v422_v31 = vld [vmem:[#allocation8 + $0x628] sm:$0xff]  ;;  %v285_v32 = vld [vmem:[#allocation8 + $0x1e0] sm:$0xff] }
  0xa8   :  { %631 = vmatpush.msra.mxu0 %v252_v35  ;;  %651 = vmatpush.msra.mxu1 %v380_v36  ;;  %v414_v35 = vld [vmem:[#allocation8 + $0x5e8] sm:$0xff]  ;;  %v277_v36 = vld [vmem:[#allocation8 + $0x1a0] sm:$0xff] }
  0xaa   :  { %632 = vmatpush.msra.mxu0 %v244_v40  ;;  %652 = vmatpush.msra.mxu1 %v372_v41  ;;  %v406_v40 = vld [vmem:[#allocation8 + $0x5a8] sm:$0xff]  ;;  %v269_v41 = vld [vmem:[#allocation8 + $0x160] sm:$0xff] }
  0xac   :  { %633 = vmatpush.msra.mxu0 %v236_v44  ;;  %653 = vmatpush.msra.mxu1 %v364_v45  ;;  %v398_v44 = vld [vmem:[#allocation8 + $0x568] sm:$0xff]  ;;  %v261_v45 = vld [vmem:[#allocation8 + $0x120] sm:$0xff] }
  0xae   :  { %634 = vmatpush.msra.mxu0 %v228_v48  ;;  %654 = vmatpush.msra.mxu1 %v356_v49  ;;  %v390_v48 = vld [vmem:[#allocation8 + $0x528] sm:$0xff]  ;;  %v253_v49 = vld [vmem:[#allocation8 + $0xe0] sm:$0xff] }
 0x109   :  { %v211_v2 = vpop.permute.xlu1 %210 }
 0x10a   :  { %v213_v55 = vmul.f32 0.0, %v211_v2  ;;  %v214_v56 = vmul.f32 %v2015_v53, %v211_v2  ;;  %v245_v53 = vld [vmem:[#allocation8 + $0xa0] sm:$0xff] }
 0x10b   :  { %v373_v2 = vld [vmem:[#allocation8 + $0x4a0] sm:$0xff] }
 0x10c   :  { %v161_v57 = vpop.f32.mrf.mxu0  ;;  %v181_v58 = vpop.f32.mrf.mxu1 }
 0x10d   :  { %v191_v18 = vsel %vm190_vm5, %v161_v57, 0.0  ;;  %v192_v60 = vsel %vm190_vm5, %v181_v58, 0.0  ;;  %v365_v57 = vld [vmem:[#allocation8 + $0x460] sm:$0xff]  ;;  %v238_v58 = vld [vmem:[#allocation8 + $0x68] sm:$0xff] }
 0x10e   :  { %v3024_v61 = vadd.f32 %v213_v55, %v191_v18  ;;  %v3026_v9 = vadd.f32 %v214_v56, %v192_v60  ;;  %v374_v55 = vld [vmem:[#allocation8 + $0x4a8] sm:$0xff]  ;;  %v237_v56 = vld [vmem:[#allocation8 + $0x60] sm:$0xff] }
 0x10f   :  { %v366_v18 = vld [vmem:[#allocation8 + $0x468] sm:$0xff]  ;;  %v229_v60 = vld [vmem:[#allocation8 + $0x20] sm:$0xff] }
 0x110   :  { %2016 = vmatmul.msk.f32.vlgmr.msra.gmra.mxu2 %vm3020_vm6, %v3024_v61  ;;  %2017 = vmatmul.msk.f32.vlgmr.msra.gmra.mxu3 %vm3020_vm6, %v3026_v9 }
 0x111   :  { %2018 = vmatmul.msk.f32.vlgmr.msrb.gmra.mxu0 %vm3020_vm6, %v3024_v61  ;;  %2019 = vmatmul.msk.f32.vlgmr.msrb.gmra.mxu1 %vm3020_vm6, %v3026_v9 }
 0x112   :  { %659 = vmatpush.msra.mxu2 %v349_v37  ;;  %679 = vmatpush.msra.mxu3 %v477_v62  ;;  %v357_v37 = vld [vmem:[#allocation8 + $0x420] sm:$0xff]  ;;  %v230_v62 = vld [vmem:[#allocation8 + $0x28] sm:$0xff] }
 0x113   :  { %699 = vmatpush.msrb.mxu0 %v350_v63  ;;  %719 = vmatpush.msrb.mxu1 %v478_v0  ;;  %v358_v63 = vld [vmem:[#allocation8 + $0x428] sm:$0xff]  ;;  %v351_v0 = vld [vmem:[#allocation8 + $0x3f0] sm:$0xff] }
 0x114   :  { %660 = vmatpush.msra.mxu2 %v341_v1  ;;  %680 = vmatpush.msra.mxu3 %v469_v3  ;;  %v479_v1 = vld [vmem:[#allocation8 + $0x7f0] sm:$0xff]  ;;  %v352_v3 = vld [vmem:[#allocation8 + $0x3f8] sm:$0xff] }
 0x115   :  { %700 = vmatpush.msrb.mxu0 %v342_v4  ;;  %720 = vmatpush.msrb.mxu1 %v470_v5  ;;  %v480_v4 = vld [vmem:[#allocation8 + $0x7f8] sm:$0xff]  ;;  %v343_v5 = vld [vmem:[#allocation8 + $0x3b0] sm:$0xff] }
 0x116   :  { %661 = vmatpush.msra.mxu2 %v333_v6  ;;  %681 = vmatpush.msra.mxu3 %v461_v7  ;;  %v471_v6 = vld [vmem:[#allocation8 + $0x7b0] sm:$0xff]  ;;  %v344_v7 = vld [vmem:[#allocation8 + $0x3b8] sm:$0xff] }
 0x117   :  { %701 = vmatpush.msrb.mxu0 %v334_v8  ;;  %721 = vmatpush.msrb.mxu1 %v462_v10  ;;  %v472_v8 = vld [vmem:[#allocation8 + $0x7b8] sm:$0xff]  ;;  %v335_v10 = vld [vmem:[#allocation8 + $0x370] sm:$0xff] }
 0x118   :  { %662 = vmatpush.msra.mxu2 %v325_v11  ;;  %682 = vmatpush.msra.mxu3 %v453_v12  ;;  %v463_v11 = vld [vmem:[#allocation8 + $0x770] sm:$0xff]  ;;  %v336_v12 = vld [vmem:[#allocation8 + $0x378] sm:$0xff] }
 0x119   :  { %702 = vmatpush.msrb.mxu0 %v326_v13  ;;  %722 = vmatpush.msrb.mxu1 %v454_v14  ;;  %v464_v13 = vld [vmem:[#allocation8 + $0x778] sm:$0xff]  ;;  %v327_v14 = vld [vmem:[#allocation8 + $0x330] sm:$0xff] }
 0x11a   :  { %2020 = vmatmul.msk.f32.vlgmr.msrb.gmra.mxu2 %vm3020_vm6, %v3024_v61  ;;  %2021 = vmatmul.msk.f32.vlgmr.msrb.gmra.mxu3 %vm3020_vm6, %v3026_v9 }
 0x11b   :  { %2022 = vmatmul.msk.f32.vlgmr.msra.gmra.mxu0 %vm3020_vm6, %v3024_v61  ;;  %2023 = vmatmul.msk.f32.vlgmr.msra.gmra.mxu1 %vm3020_vm6, %v3026_v9 }
 0x11c   :  { %663 = vmatpush.msra.mxu2 %v317_v15  ;;  %683 = vmatpush.msra.mxu3 %v445_v16  ;;  %v455_v15 = vld [vmem:[#allocation8 + $0x730] sm:$0xff]  ;;  %v328_v16 = vld [vmem:[#allocation8 + $0x338] sm:$0xff] }
 0x11d   :  { %703 = vmatpush.msrb.mxu0 %v318_v17  ;;  %723 = vmatpush.msrb.mxu1 %v446_v19  ;;  %v456_v17 = vld [vmem:[#allocation8 + $0x738] sm:$0xff]  ;;  %v319_v19 = vld [vmem:[#allocation8 + $0x2f0] sm:$0xff] }
 0x11e   :  { %664 = vmatpush.msra.mxu2 %v309_v20  ;;  %684 = vmatpush.msra.mxu3 %v437_v21  ;;  %v447_v20 = vld [vmem:[#allocation8 + $0x6f0] sm:$0xff]  ;;  %v320_v21 = vld [vmem:[#allocation8 + $0x2f8] sm:$0xff] }
 0x11f   :  { %704 = vmatpush.msrb.mxu0 %v310_v22  ;;  %724 = vmatpush.msrb.mxu1 %v438_v23  ;;  %v448_v22 = vld [vmem:[#allocation8 + $0x6f8] sm:$0xff]  ;;  %v311_v23 = vld [vmem:[#allocation8 + $0x2b0] sm:$0xff] }
 0x120   :  { %665 = vmatpush.msra.mxu2 %v301_v24  ;;  %685 = vmatpush.msra.mxu3 %v429_v25  ;;  %v439_v24 = vld [vmem:[#allocation8 + $0x6b0] sm:$0xff]  ;;  %v312_v25 = vld [vmem:[#allocation8 + $0x2b8] sm:$0xff] }
 0x121   :  { %705 = vmatpush.msrb.mxu0 %v302_v26  ;;  %725 = vmatpush.msrb.mxu1 %v430_v27  ;;  %v440_v26 = vld [vmem:[#allocation8 + $0x6b8] sm:$0xff]  ;;  %v303_v27 = vld [vmem:[#allocation8 + $0x270] sm:$0xff] }
 0x122   :  { %666 = vmatpush.msra.mxu2 %v293_v28  ;;  %686 = vmatpush.msra.mxu3 %v421_v29  ;;  %v431_v28 = vld [vmem:[#allocation8 + $0x670] sm:$0xff]  ;;  %v304_v29 = vld [vmem:[#allocation8 + $0x278] sm:$0xff] }
 0x123   :  { %706 = vmatpush.msrb.mxu0 %v294_v30  ;;  %726 = vmatpush.msrb.mxu1 %v422_v31  ;;  %v432_v30 = vld [vmem:[#allocation8 + $0x678] sm:$0xff]  ;;  %v295_v31 = vld [vmem:[#allocation8 + $0x230] sm:$0xff] }
 0x124   :  { %667 = vmatpush.msra.mxu2 %v285_v32  ;;  %687 = vmatpush.msra.mxu3 %v413_v33  ;;  %v423_v32 = vld [vmem:[#allocation8 + $0x630] sm:$0xff]  ;;  %v296_v33 = vld [vmem:[#allocation8 + $0x238] sm:$0xff] }
 0x125   :  { %707 = vmatpush.msrb.mxu0 %v286_v34  ;;  %727 = vmatpush.msrb.mxu1 %v414_v35  ;;  %v424_v34 = vld [vmem:[#allocation8 + $0x638] sm:$0xff]  ;;  %v287_v35 = vld [vmem:[#allocation8 + $0x1f0] sm:$0xff] }
 0x126   :  { %668 = vmatpush.msra.mxu2 %v277_v36  ;;  %688 = vmatpush.msra.mxu3 %v405_v38  ;;  %v415_v36 = vld [vmem:[#allocation8 + $0x5f0] sm:$0xff]  ;;  %v288_v38 = vld [vmem:[#allocation8 + $0x1f8] sm:$0xff] }
 0x127   :  { %708 = vmatpush.msrb.mxu0 %v278_v39  ;;  %728 = vmatpush.msrb.mxu1 %v406_v40  ;;  %v416_v39 = vld [vmem:[#allocation8 + $0x5f8] sm:$0xff]  ;;  %v279_v40 = vld [vmem:[#allocation8 + $0x1b0] sm:$0xff] }
 0x128   :  { %669 = vmatpush.msra.mxu2 %v269_v41  ;;  %689 = vmatpush.msra.mxu3 %v397_v42  ;;  %v407_v41 = vld [vmem:[#allocation8 + $0x5b0] sm:$0xff]  ;;  %v280_v42 = vld [vmem:[#allocation8 + $0x1b8] sm:$0xff] }
 0x129   :  { %709 = vmatpush.msrb.mxu0 %v270_v43  ;;  %729 = vmatpush.msrb.mxu1 %v398_v44  ;;  %v408_v43 = vld [vmem:[#allocation8 + $0x5b8] sm:$0xff]  ;;  %v271_v44 = vld [vmem:[#allocation8 + $0x170] sm:$0xff] }
 0x12a   :  { %670 = vmatpush.msra.mxu2 %v261_v45  ;;  %690 = vmatpush.msra.mxu3 %v389_v46  ;;  %v399_v45 = vld [vmem:[#allocation8 + $0x570] sm:$0xff]  ;;  %v272_v46 = vld [vmem:[#allocation8 + $0x178] sm:$0xff] }
 0x12b   :  { %710 = vmatpush.msrb.mxu0 %v262_v47  ;;  %730 = vmatpush.msrb.mxu1 %v390_v48  ;;  %v400_v47 = vld [vmem:[#allocation8 + $0x578] sm:$0xff]  ;;  %v263_v48 = vld [vmem:[#allocation8 + $0x130] sm:$0xff] }
 0x12c   :  { %671 = vmatpush.msra.mxu2 %v253_v49  ;;  %691 = vmatpush.msra.mxu3 %v381_v50  ;;  %v391_v49 = vld [vmem:[#allocation8 + $0x530] sm:$0xff]  ;;  %v264_v50 = vld [vmem:[#allocation8 + $0x138] sm:$0xff] }
 0x12d   :  { %711 = vmatpush.msrb.mxu0 %v254_v51  ;;  %731 = vmatpush.msrb.mxu1 %v382_v52  ;;  %v392_v51 = vld [vmem:[#allocation8 + $0x538] sm:$0xff]  ;;  %v255_v52 = vld [vmem:[#allocation8 + $0xf0] sm:$0xff] }
 0x12e   :  { %672 = vmatpush.msra.mxu2 %v245_v53  ;;  %692 = vmatpush.msra.mxu3 %v373_v2  ;;  %v383_v53 = vld [vmem:[#allocation8 + $0x4f0] sm:$0xff]  ;;  %v256_v2 = vld [vmem:[#allocation8 + $0xf8] sm:$0xff] }
 0x12f   :  { %712 = vmatpush.msrb.mxu0 %v246_v54  ;;  %732 = vmatpush.msrb.mxu1 %v374_v55  ;;  %v384_v54 = vld [vmem:[#allocation8 + $0x4f8] sm:$0xff]  ;;  %v247_v55 = vld [vmem:[#allocation8 + $0xb0] sm:$0xff] }
 0x130   :  { %673 = vmatpush.msra.mxu2 %v237_v56  ;;  %693 = vmatpush.msra.mxu3 %v365_v57  ;;  %v375_v56 = vld [vmem:[#allocation8 + $0x4b0] sm:$0xff]  ;;  %v248_v57 = vld [vmem:[#allocation8 + $0xb8] sm:$0xff] }
 0x131   :  { %713 = vmatpush.msrb.mxu0 %v238_v58  ;;  %733 = vmatpush.msrb.mxu1 %v366_v18  ;;  %v376_v58 = vld [vmem:[#allocation8 + $0x4b8] sm:$0xff]  ;;  %v239_v18 = vld [vmem:[#allocation8 + $0x70] sm:$0xff] }
 0x132   :  { %674 = vmatpush.msra.mxu2 %v229_v60  ;;  %694 = vmatpush.msra.mxu3 %v357_v37  ;;  %v367_v60 = vld [vmem:[#allocation8 + $0x470] sm:$0xff]  ;;  %v240_v37 = vld [vmem:[#allocation8 + $0x78] sm:$0xff] }
 0x133   :  { %714 = vmatpush.msrb.mxu0 %v230_v62  ;;  %734 = vmatpush.msrb.mxu1 %v358_v63  ;;  %v368_v62 = vld [vmem:[#allocation8 + $0x478] sm:$0xff]  ;;  %v231_v63 = vld [vmem:[#allocation8 + $0x30] sm:$0xff] }
 0x134   :  { %2024 = vmatmul.msk.f32.vlgmr.msra.gmra.mxu2 %vm3020_vm6, %v3024_v61  ;;  %2025 = vmatmul.msk.f32.vlgmr.msra.gmra.mxu3 %vm3020_vm6, %v3026_v9 }
 0x135   :  { %2026 = vmatmul.msk.f32.vlgmr.msrb.gmra.mxu0 %vm3020_vm6, %v3024_v61  ;;  %2027 = vmatmul.msk.f32.vlgmr.msrb.gmra.mxu1 %vm3020_vm6, %v3026_v9 }
 0x136   :  { %739 = vmatpush.msrb.mxu2 %v351_v0  ;;  %759 = vmatpush.msrb.mxu3 %v479_v1  ;;  %v359_v0 = vld [vmem:[#allocation8 + $0x430] sm:$0xff]  ;;  %v232_v1 = vld [vmem:[#allocation8 + $0x38] sm:$0xff] }
 0x137   :  { %779 = vmatpush.msra.mxu0 %v352_v3  ;;  %799 = vmatpush.msra.mxu1 %v480_v4  ;;  %v360_v3 = vld [vmem:[#allocation8 + $0x438] sm:$0xff] }
 0x138   :  { %740 = vmatpush.msrb.mxu2 %v343_v5  ;;  %760 = vmatpush.msrb.mxu3 %v471_v6  ;;  %v481_v4 = vld [vmem:[%s3155_s5] sm:$0xff] }
 0x139   :  { %780 = vmatpush.msra.mxu0 %v344_v7  ;;  %800 = vmatpush.msra.mxu1 %v472_v8  ;;  %v484_v5 = vperm.slane %v481_v4, 1 }
 0x13a   :  { %741 = vmatpush.msrb.mxu2 %v335_v10  ;;  %761 = vmatpush.msrb.mxu3 %v463_v11  ;;  %v483_v10 = vperm.slane %v481_v4, 0 }
 0x13b   :  { %781 = vmatpush.msra.mxu0 %v336_v12  ;;  %801 = vmatpush.msra.mxu1 %v464_v13 }
 0x13c   :  { %742 = vmatpush.msrb.mxu2 %v327_v14  ;;  %762 = vmatpush.msrb.mxu3 %v455_v15  ;;  %v486_v15 = vperm.slane %v481_v4, 3 }
 0x13d   :  { %782 = vmatpush.msra.mxu0 %v328_v16  ;;  %802 = vmatpush.msra.mxu1 %v456_v17  ;;  %v485_v17 = vperm.slane %v481_v4, 2 }
 0x13e   :  { %743 = vmatpush.msrb.mxu2 %v319_v19  ;;  %763 = vmatpush.msrb.mxu3 %v447_v20 }
 0x13f   :  { %783 = vmatpush.msra.mxu0 %v320_v21  ;;  %803 = vmatpush.msra.mxu1 %v448_v22 }
 0x140   :  { %744 = vmatpush.msrb.mxu2 %v311_v23  ;;  %764 = vmatpush.msrb.mxu3 %v439_v24  ;;  %v488_v24 = vperm.slane %v481_v4, 5 }
 0x141   :  { %784 = vmatpush.msra.mxu0 %v312_v25  ;;  %804 = vmatpush.msra.mxu1 %v440_v26 }
 0x142   :  { %745 = vmatpush.msrb.mxu2 %v303_v27  ;;  %765 = vmatpush.msrb.mxu3 %v431_v28  ;;  %v487_v28 = vperm.slane %v481_v4, 4 }
 0x143   :  { %785 = vmatpush.msra.mxu0 %v304_v29  ;;  %805 = vmatpush.msra.mxu1 %v432_v30 }
 0x144   :  { %746 = vmatpush.msrb.mxu2 %v295_v31  ;;  %766 = vmatpush.msrb.mxu3 %v423_v32 }
 0x145   :  { %786 = vmatpush.msra.mxu0 %v296_v33  ;;  %806 = vmatpush.msra.mxu1 %v424_v34  ;;  %v490_v34 = vperm.slane %v481_v4, 7 }
 0x146   :  { %747 = vmatpush.msrb.mxu2 %v287_v35  ;;  %767 = vmatpush.msrb.mxu3 %v415_v36 }
 0x147   :  { %787 = vmatpush.msra.mxu0 %v288_v38  ;;  %807 = vmatpush.msra.mxu1 %v416_v39  ;;  %v489_v39 = vperm.slane %v481_v4, 6 }
 0x148   :  { %748 = vmatpush.msrb.mxu2 %v279_v40  ;;  %768 = vmatpush.msrb.mxu3 %v407_v41 }
 0x149   :  { %788 = vmatpush.msra.mxu0 %v280_v42  ;;  %808 = vmatpush.msra.mxu1 %v408_v43 }
 0x14a   :  { %749 = vmatpush.msrb.mxu2 %v271_v44  ;;  %769 = vmatpush.msrb.mxu3 %v399_v45  ;;  %v3082_v45 = vmov 0.0  }
 0x14b   :  { %789 = vmatpush.msra.mxu0 %v272_v46  ;;  %809 = vmatpush.msra.mxu1 %v400_v47 }
 0x14c   :  { %750 = vmatpush.msrb.mxu2 %v263_v48  ;;  %770 = vmatpush.msrb.mxu3 %v391_v49 }
 0x14d   :  { %790 = vmatpush.msra.mxu0 %v264_v50  ;;  %810 = vmatpush.msra.mxu1 %v392_v51 }
 0x14e   :  { %751 = vmatpush.msrb.mxu2 %v255_v52  ;;  %771 = vmatpush.msrb.mxu3 %v383_v53 }
 0x14f   :  { %791 = vmatpush.msra.mxu0 %v256_v2  ;;  %811 = vmatpush.msra.mxu1 %v384_v54 }
 0x150   :  { %752 = vmatpush.msrb.mxu2 %v247_v55  ;;  %772 = vmatpush.msrb.mxu3 %v375_v56 }
 0x151   :  { %792 = vmatpush.msra.mxu0 %v248_v57  ;;  %812 = vmatpush.msra.mxu1 %v376_v58 }
 0x152   :  { %753 = vmatpush.msrb.mxu2 %v239_v18  ;;  %773 = vmatpush.msrb.mxu3 %v367_v60 }
 0x153   :  { %793 = vmatpush.msra.mxu0 %v240_v37  ;;  %813 = vmatpush.msra.mxu1 %v368_v62 }
 0x154   :  { %754 = vmatpush.msrb.mxu2 %v231_v63  ;;  %774 = vmatpush.msrb.mxu3 %v359_v0 }
 0x155   :  { %794 = vmatpush.msra.mxu0 %v232_v1  ;;  %814 = vmatpush.msra.mxu1 %v360_v3 }
 0x156   :  { %2028 = vmatmul.msk.f32.vlgmr.msrb.gmra.mxu2 %vm3020_vm6, %v3024_v61  ;;  %2029 = vmatmul.msk.f32.vlgmr.msrb.gmra.mxu3 %vm3020_vm6, %v3026_v9 }
 0x157   :  { %2030 = vmatmul.msk.f32.vlgmr.msra.gmra.mxu0 %vm3020_vm6, %v3024_v61  ;;  %2031 = vmatmul.msk.f32.vlgmr.msra.gmra.mxu1 %vm3020_vm6, %v3026_v9 }
 0x18e   :  { %v556_v6 = vpop.f32.mrf.mxu0  ;;  %v576_v8 = vpop.f32.mrf.mxu1 }
 0x18f   :  { %v557_v7 = vadd.f32 %v556_v6, %v484_v5 }
 0x191   :  { %v577_v11 = vadd.f32 %v576_v8, %v557_v7 }
 0x193   :  { %820 = vst [vmem:[#allocation2 + $0x8] sm:$0xff] %v577_v11  ;;  %v516_v12 = vpop.f32.mrf.mxu2  ;;  %v536_v14 = vpop.f32.mrf.mxu3 }
 0x194   :  { %v517_v13 = vadd.f32 %v516_v12, %v483_v10 }
 0x196   :  { %v537_v61 = vadd.f32 %v536_v14, %v517_v13 }
 0x198   :  { %819 = vst [vmem:[#allocation2] sm:$0xff] %v537_v61  ;;  %v636_v16 = vpop.f32.mrf.mxu0  ;;  %v656_v9 = vpop.f32.mrf.mxu1 }
 0x199   :  { %v637_v59 = vadd.f32 %v636_v16, %v486_v15 }
 0x19b   :  { %v657_v19 = vadd.f32 %v656_v9, %v637_v59 }
 0x19d   :  { %822 = vst [vmem:[#allocation2 + $0x18] sm:$0xff] %v657_v19  ;;  %v596_v20 = vpop.f32.mrf.mxu2  ;;  %v616_v22 = vpop.f32.mrf.mxu3 }
 0x19e   :  { %v597_v21 = vadd.f32 %v596_v20, %v485_v17 }
 0x1a0   :  { %v617_v23 = vadd.f32 %v616_v22, %v597_v21 }
 0x1a2   :  { %821 = vst [vmem:[#allocation2 + $0x10] sm:$0xff] %v617_v23 }
 0x1b2   :  { %v716_v25 = vpop.f32.mrf.mxu0  ;;  %v736_v27 = vpop.f32.mrf.mxu1 }
 0x1b3   :  { %v717_v26 = vadd.f32 %v716_v25, %v488_v24 }
 0x1b5   :  { %v737_v29 = vadd.f32 %v736_v27, %v717_v26 }
 0x1b7   :  { %824 = vst [vmem:[#allocation2 + $0x28] sm:$0xff] %v737_v29  ;;  %v676_v30 = vpop.f32.mrf.mxu2  ;;  %v696_v32 = vpop.f32.mrf.mxu3 }
 0x1b8   :  { %v677_v31 = vadd.f32 %v676_v30, %v487_v28 }
 0x1ba   :  { %v697_v33 = vadd.f32 %v696_v32, %v677_v31 }
 0x1bc   :  { %823 = vst [vmem:[#allocation2 + $0x20] sm:$0xff] %v697_v33 }
 0x1d4   :  { %v796_v35 = vpop.f32.mrf.mxu0  ;;  %v816_v38 = vpop.f32.mrf.mxu1 }
 0x1d5   :  { %v797_v36 = vadd.f32 %v796_v35, %v490_v34 }
 0x1d7   :  { %v817_v40 = vadd.f32 %v816_v38, %v797_v36 }
 0x1d9   :  { %826 = vst [vmem:[#allocation2 + $0x38] sm:$0xff] %v817_v40  ;;  %v756_v41 = vpop.f32.mrf.mxu2  ;;  %v776_v43 = vpop.f32.mrf.mxu3 }
 0x1da   :  { %v757_v42 = vadd.f32 %v756_v41, %v489_v39  ;;  %2005 = sbr.rel (%p2032_p0) target bundleno = 783 (0x30f), region = 78 }
 0x1dc   :  { %v777_v44 = vadd.f32 %v776_v43, %v757_v42 }
 0x1de   :  { %825 = vst [vmem:[#allocation2 + $0x30] sm:$0xff] %v777_v44 }
 0x1df   :  { %v3084_v46 = vmov 0.0   ;;  %v3086_v47 = vmov 0.0  }
 0x1e0 LB: > { %v2261_v48 = vld [vmem:[#allocation10 + $0x1c0] sm:$0xf]  ;;  %v2605_v53 = vld [vmem:[#allocation10 + $0x1c4] sm:$0xf]  ;;  %vm1844_vm7 = vcmask 1040384   ;;  %vm1846_vm8 = vcmask 1042434   ;;  %s2896_s9 = sphi %s3088_s9, %s830_s9   ;;  %v2892_v47 = vphi %v3086_v47, %v3163_v47   ;;  %v2888_v46 = vphi %v3084_v46, %v1882_v46  }
 0x1e1   : > { %v2609_v49 = vld [vmem:[#allocation10 + $0x1dc] sm:$0xf0]  ;;  %v2263_v2 = vld [vmem:[#allocation10 + $0x1e0] sm:$0xf0]  ;;  %vm1848_vm9 = vcmask 1041408   ;;  %s835_s25 = sshra.s32 %s2896_s9, 3 }
 0x1e2   : > { %v2517_v50 = vld [vmem:[#allocation10 + $0x3c0] sm:$0xf]  ;;  %v2262_v51 = vor.u32 %v2609_v49, %v2261_v48  ;;  %v2266_v55 = vor.u32 %v2605_v53, %v2263_v2  ;;  %v2669_v56 = vld [vmem:[#allocation10 + $0x3c4] sm:$0xf]  ;;  %s838_s26 = sand.u32 7, %s2896_s9  ;;  %s2548_s27 = sshll.u32 %s835_s25, 6 }
 0x1e3   : > { %v2673_v52 = vld [vmem:[#allocation10 + $0x3dc] sm:$0xf0]  ;;  %v2519_v57 = vld [vmem:[#allocation10 + $0x3e0] sm:$0xf0]  ;;  %s841_s3 = sadd.s32 %s2548_s27, %s838_s26  ;;  %vm1850_vm10 = vcmask 1044484   ;;  %vm1852_vm11 = vcmask 1046534  }
 0x1e4   : > { %v2518_v54 = vor.u32 %v2673_v52, %v2517_v50  ;;  %v2229_v58 = vld [vmem:[#allocation10 + $0x180] sm:$0xf]  ;;  %1621 = vmatpush.bf16.msra.mxu0 %v2262_v51  ;;  %v2522_v18 = vor.u32 %v2669_v56, %v2519_v57  ;;  %1647 = vmatpush.bf16.msra.mxu2 %v2266_v55  ;;  %v2597_v1 = vld [vmem:[#allocation10 + $0x184] sm:$0xf]  ;;  %s842_s28 = scalar_lea.vmem [#allocation2], %s841_s3  ;;  %vm1854_vm12 = vcmask 1045508  }
 0x1e5   : > { %v2601_v60 = vld [vmem:[#allocation10 + $0x19c] sm:$0xf0]  ;;  %v2231_v3 = vld [vmem:[#allocation10 + $0x1a0] sm:$0xf0]  ;;  %vm1856_vm13 = vcmask 1043456   ;;  %s830_s9 = sadd.s32 1, %s2896_s9  }
 0x1e6   : > { %v2485_v37 = vld [vmem:[#allocation10 + $0x380] sm:$0xf]  ;;  %1634 = vmatpush.bf16.msra.mxu1 %v2518_v54  ;;  %v2230_v63 = vor.u32 %v2601_v60, %v2229_v58  ;;  %v2661_v4 = vld [vmem:[#allocation10 + $0x384] sm:$0xf]  ;;  %1660 = vmatpush.bf16.msra.mxu3 %v2522_v18  ;;  %v2234_v5 = vor.u32 %v2597_v1, %v2231_v3  ;;  %p829_p1 = scmp.ge.s32.totalorder %s830_s9, %s3150_s0 }
 0x1e7   : > { %v2665_v62 = vld [vmem:[#allocation10 + $0x39c] sm:$0xf0]  ;;  %v2487_v6 = vld [vmem:[#allocation10 + $0x3a0] sm:$0xf0] }
 0x1e8   : > { %v2486_v0 = vor.u32 %v2665_v62, %v2485_v37  ;;  %v2197_v7 = vld [vmem:[#allocation10 + $0x140] sm:$0xf]  ;;  %v2490_v10 = vor.u32 %v2661_v4, %v2487_v6  ;;  %v2589_v13 = vld [vmem:[#allocation10 + $0x144] sm:$0xf]  ;;  %1622 = vmatpush.bf16.msra.mxu0 %v2230_v63  ;;  %1648 = vmatpush.bf16.msra.mxu2 %v2234_v5 }
 0x1e9   : > { %v2593_v8 = vld [vmem:[#allocation10 + $0x15c] sm:$0xf0]  ;;  %v2199_v15 = vld [vmem:[#allocation10 + $0x160] sm:$0xf0] }
 0x1ea   : > { %v2453_v11 = vld [vmem:[#allocation10 + $0x340] sm:$0xf]  ;;  %v2198_v14 = vor.u32 %v2593_v8, %v2197_v7  ;;  %v2653_v61 = vld [vmem:[#allocation10 + $0x344] sm:$0xf]  ;;  %1635 = vmatpush.bf16.msra.mxu1 %v2486_v0  ;;  %v2202_v9 = vor.u32 %v2589_v13, %v2199_v15  ;;  %1661 = vmatpush.bf16.msra.mxu3 %v2490_v10  ;;  %v2269_v15 = vld [vmem:[#allocation10 + $0x1c8] sm:$0xf] }
 0x1eb   : > { %v2657_v12 = vld [vmem:[#allocation10 + $0x35c] sm:$0xf0]  ;;  %v2455_v16 = vld [vmem:[#allocation10 + $0x360] sm:$0xf0] }
 0x1ec   : > { %v2454_v59 = vor.u32 %v2657_v12, %v2453_v11  ;;  %v2165_v17 = vld [vmem:[#allocation10 + $0x100] sm:$0xf]  ;;  %v2458_v21 = vor.u32 %v2653_v61, %v2455_v16  ;;  %v2581_v23 = vld [vmem:[#allocation10 + $0x104] sm:$0xf]  ;;  %1623 = vmatpush.bf16.msra.mxu0 %v2198_v14  ;;  %1649 = vmatpush.bf16.msra.mxu2 %v2202_v9  ;;  %v2610_v61 = vld [vmem:[#allocation10 + $0x1e4] sm:$0xf0] }
 0x1ed   : > { %v2585_v19 = vld [vmem:[#allocation10 + $0x11c] sm:$0xf0]  ;;  %v2167_v24 = vld [vmem:[#allocation10 + $0x120] sm:$0xf0]  ;;  %v2525_v16 = vld [vmem:[#allocation10 + $0x3c8] sm:$0xf] }
 0x1ee   : > { %v2421_v20 = vld [vmem:[#allocation10 + $0x300] sm:$0xf]  ;;  %v2645_v25 = vld [vmem:[#allocation10 + $0x304] sm:$0xf]  ;;  %v2166_v27 = vor.u32 %v2585_v19, %v2165_v17  ;;  %1636 = vmatpush.bf16.msra.mxu1 %v2454_v59  ;;  %v2170_v29 = vor.u32 %v2581_v23, %v2167_v24  ;;  %1662 = vmatpush.bf16.msra.mxu3 %v2458_v21  ;;  %v2674_v9 = vld [vmem:[#allocation10 + $0x3e4] sm:$0xf0] }
 0x1ef   : > { %v2649_v22 = vld [vmem:[#allocation10 + $0x31c] sm:$0xf0]  ;;  %v2423_v26 = vld [vmem:[#allocation10 + $0x320] sm:$0xf0]  ;;  %v2606_v17 = vld [vmem:[#allocation10 + $0x1cc] sm:$0xf] }
 0x1f0   : > { %v2422_v28 = vor.u32 %v2649_v22, %v2421_v20  ;;  %v2133_v30 = vld [vmem:[#allocation10 + $0xc0] sm:$0xf]  ;;  %v2426_v33 = vor.u32 %v2645_v25, %v2423_v26  ;;  %v2573_v35 = vld [vmem:[#allocation10 + $0xc4] sm:$0xf]  ;;  %1624 = vmatpush.bf16.msra.mxu0 %v2166_v27  ;;  %1650 = vmatpush.bf16.msra.mxu2 %v2170_v29  ;;  %v2271_v19 = vld [vmem:[#allocation10 + $0x1e8] sm:$0xf0]  ;;  %v2270_v25 = vor.u32 %v2610_v61, %v2269_v15 }
 0x1f1   : > { %v2577_v31 = vld [vmem:[#allocation10 + $0xdc] sm:$0xf0]  ;;  %v2135_v36 = vld [vmem:[#allocation10 + $0xe0] sm:$0xf0]  ;;  %v2670_v22 = vld [vmem:[#allocation10 + $0x3cc] sm:$0xf]  ;;  %v2526_v27 = vor.u32 %v2674_v9, %v2525_v16 }
 0x1f2   : > { %v2389_v32 = vld [vmem:[#allocation10 + $0x2c0] sm:$0xf]  ;;  %v2637_v38 = vld [vmem:[#allocation10 + $0x2c4] sm:$0xf]  ;;  %v2134_v40 = vor.u32 %v2577_v31, %v2133_v30  ;;  %1637 = vmatpush.bf16.msra.mxu1 %v2422_v28  ;;  %v2138_v42 = vor.u32 %v2573_v35, %v2135_v36  ;;  %1663 = vmatpush.bf16.msra.mxu3 %v2426_v33  ;;  %v2527_v23 = vld [vmem:[#allocation10 + $0x3e8] sm:$0xf0]  ;;  %v2274_v28 = vor.u32 %v2606_v17, %v2271_v19 }
 0x1f3   : > { %v2641_v34 = vld [vmem:[#allocation10 + $0x2dc] sm:$0xf0]  ;;  %v2391_v39 = vld [vmem:[#allocation10 + $0x2e0] sm:$0xf0]  ;;  %v2237_v26 = vld [vmem:[#allocation10 + $0x188] sm:$0xf] }
 0x1f4   : > { %v2390_v41 = vor.u32 %v2641_v34, %v2389_v32  ;;  %v2101_v43 = vld [vmem:[#allocation10 + $0x80] sm:$0xf]  ;;  %v2394_v48 = vor.u32 %v2637_v38, %v2391_v39  ;;  %v2565_v50 = vld [vmem:[#allocation10 + $0x84] sm:$0xf]  ;;  %1625 = vmatpush.bf16.msra.mxu0 %v2134_v40  ;;  %1651 = vmatpush.bf16.msra.mxu2 %v2138_v42  ;;  %v2602_v29 = vld [vmem:[#allocation10 + $0x1a4] sm:$0xf0]  ;;  %v2530_v32 = vor.u32 %v2670_v22, %v2527_v23 }
 0x1f5   : > { %v2569_v44 = vld [vmem:[#allocation10 + $0x9c] sm:$0xf0]  ;;  %v2103_v51 = vld [vmem:[#allocation10 + $0xa0] sm:$0xf0]  ;;  %v2493_v30 = vld [vmem:[#allocation10 + $0x388] sm:$0xf]  ;;  %v2238_v40 = vor.u32 %v2602_v29, %v2237_v26 }
 0x1f6   : > { %v2357_v45 = vld [vmem:[#allocation10 + $0x280] sm:$0xf]  ;;  %v2629_v52 = vld [vmem:[#allocation10 + $0x284] sm:$0xf]  ;;  %v2102_v2 = vor.u32 %v2569_v44, %v2101_v43  ;;  %1638 = vmatpush.bf16.msra.mxu1 %v2390_v41  ;;  %v2106_v55 = vor.u32 %v2565_v50, %v2103_v51  ;;  %1664 = vmatpush.bf16.msra.mxu3 %v2394_v48  ;;  %v2666_v31 = vld [vmem:[#allocation10 + $0x3a4] sm:$0xf0] }
 0x1f7   : > { %v2633_v49 = vld [vmem:[#allocation10 + $0x29c] sm:$0xf0]  ;;  %v2359_v53 = vld [vmem:[#allocation10 + $0x2a0] sm:$0xf0]  ;;  %v2598_v33 = vld [vmem:[#allocation10 + $0x18c] sm:$0xf]  ;;  %v2494_v41 = vor.u32 %v2666_v31, %v2493_v30 }
 0x1f8   : > { %v2358_v54 = vor.u32 %v2633_v49, %v2357_v45  ;;  %v2069_v56 = vld [vmem:[#allocation10 + $0x40] sm:$0xf]  ;;  %v2362_v18 = vor.u32 %v2629_v52, %v2359_v53  ;;  %v2557_v37 = vld [vmem:[#allocation10 + $0x44] sm:$0xf]  ;;  %1626 = vmatpush.bf16.msra.mxu0 %v2102_v2  ;;  %1652 = vmatpush.bf16.msra.mxu2 %v2106_v55  ;;  %v2239_v34 = vld [vmem:[#allocation10 + $0x1a8] sm:$0xf0] }
 0x1f9   : > { %v2561_v57 = vld [vmem:[#allocation10 + $0x5c] sm:$0xf0]  ;;  %v2071_v62 = vld [vmem:[#allocation10 + $0x60] sm:$0xf0]  ;;  %v2662_v35 = vld [vmem:[#allocation10 + $0x38c] sm:$0xf]  ;;  %v2242_v42 = vor.u32 %v2598_v33, %v2239_v34 }
 0x1fa   : > { %v2325_v58 = vld [vmem:[#allocation10 + $0x240] sm:$0xf]  ;;  %v2621_v63 = vld [vmem:[#allocation10 + $0x244] sm:$0xf]  ;;  %v2070_v1 = vor.u32 %v2561_v57, %v2069_v56  ;;  %1639 = vmatpush.bf16.msra.mxu1 %v2358_v54  ;;  %v2074_v6 = vor.u32 %v2557_v37, %v2071_v62  ;;  %1665 = vmatpush.bf16.msra.mxu3 %v2362_v18  ;;  %v2495_v36 = vld [vmem:[#allocation10 + $0x3a8] sm:$0xf0] }
 0x1fb   : > { %v2625_v60 = vld [vmem:[#allocation10 + $0x25c] sm:$0xf0]  ;;  %v2327_v0 = vld [vmem:[#allocation10 + $0x260] sm:$0xf0]  ;;  %v847_v38 = vperm.slane %v2892_v47, 0  ;;  %v848_v39 = vperm.slane %v2892_v47, 1  ;;  %v2498_v50 = vor.u32 %v2662_v35, %v2495_v36 }
 0x1fc   : > { %v2037_v3 = vld [vmem:[#allocation10] sm:$0xf]  ;;  %v2326_v5 = vor.u32 %v2625_v60, %v2325_v58  ;;  %v2549_v10 = vld [vmem:[#allocation10 + $0x4] sm:$0xf]  ;;  %v2330_v11 = vor.u32 %v2621_v63, %v2327_v0  ;;  %1627 = vmatpush.bf16.msra.mxu0 %v2070_v1  ;;  %1653 = vmatpush.bf16.msra.mxu2 %v2074_v6  ;;  %v2205_v43 = vld [vmem:[#allocation10 + $0x148] sm:$0xf] }
 0x1fd   : > { %v2553_v4 = vld [vmem:[#allocation10 + $0x1c] sm:$0xf0]  ;;  %v2039_v12 = vld [vmem:[#allocation10 + $0x20] sm:$0xf0]  ;;  %v2594_v44 = vld [vmem:[#allocation10 + $0x164] sm:$0xf0]  ;;  %v3101_v48 = vpack.c.bf16 %v847_v38, %v847_v38  ;;  %v3103_v49 = vpack.c.bf16 %v848_v39, %v848_v39 }
 0x1fe   : > { %v2293_v7 = vld [vmem:[#allocation10 + $0x200] sm:$0xf]  ;;  %v2613_v13 = vld [vmem:[#allocation10 + $0x204] sm:$0xf]  ;;  %v2038_v59 = vor.u32 %v2553_v4, %v2037_v3  ;;  %1640 = vmatpush.bf16.msra.mxu1 %v2326_v5  ;;  %v2042_v21 = vor.u32 %v2549_v10, %v2039_v12  ;;  %1666 = vmatpush.bf16.msra.mxu3 %v2330_v11  ;;  %v2461_v45 = vld [vmem:[#allocation10 + $0x348] sm:$0xf]  ;;  %v2206_v54 = vor.u32 %v2594_v44, %v2205_v43 }
 0x1ff   : > { %v2617_v8 = vld [vmem:[#allocation10 + $0x21c] sm:$0xf0]  ;;  %v2295_v14 = vld [vmem:[#allocation10 + $0x220] sm:$0xf0]  ;;  %v2658_v51 = vld [vmem:[#allocation10 + $0x364] sm:$0xf0] }
 0x200   : > { %v2294_v20 = vor.u32 %v2617_v8, %v2293_v7  ;;  %v2298_v24 = vor.u32 %v2613_v13, %v2295_v14  ;;  %1628 = vmatpush.bf16.msra.mxu0 %v2038_v59  ;;  %1654 = vmatpush.bf16.msra.mxu2 %v2042_v21  ;;  %v2590_v52 = vld [vmem:[#allocation10 + $0x14c] sm:$0xf]  ;;  %v2462_v55 = vor.u32 %v2658_v51, %v2461_v45  ;;  %v2173_v57 = vld [vmem:[#allocation10 + $0x108] sm:$0xf] }
 0x201   : > { %v2207_v53 = vld [vmem:[#allocation10 + $0x168] sm:$0xf0]  ;;  %v2586_v58 = vld [vmem:[#allocation10 + $0x124] sm:$0xf0] }
 0x202   : > { %1641 = vmatpush.bf16.msra.mxu1 %v2294_v20  ;;  %1667 = vmatpush.bf16.msra.mxu3 %v2298_v24  ;;  %v2654_v47 = vld [vmem:[#allocation10 + $0x34c] sm:$0xf]  ;;  %v2210_v56 = vor.u32 %v2590_v52, %v2207_v53  ;;  %v2429_v18 = vld [vmem:[#allocation10 + $0x308] sm:$0xf]  ;;  %v2174_v3 = vor.u32 %v2586_v58, %v2173_v57  ;;  %v2675_v57 = vld [vmem:[#allocation10 + $0x3ec] sm:$0xf0] }
 0x203   : > { %v2463_v2 = vld [vmem:[#allocation10 + $0x368] sm:$0xf0]  ;;  %1655 = vmatmul.bf16.vlgmr.msra.gmra.mxu2 %v3101_v48  ;;  %v2650_v37 = vld [vmem:[#allocation10 + $0x324] sm:$0xf0]  ;;  %1629 = vmatmul.bf16.vlgmr.msra.gmra.mxu0 %v3101_v48  ;;  %v2607_v58 = vld [vmem:[#allocation10 + $0x1d4] sm:$0xf] }
 0x204   : > { %1673 = vmatpush.bf16.msrb.mxu0 %v2270_v25  ;;  %1699 = vmatpush.bf16.msrb.mxu2 %v2274_v28  ;;  %v2466_v60 = vor.u32 %v2654_v47, %v2463_v2  ;;  %v2582_v62 = vld [vmem:[#allocation10 + $0x10c] sm:$0xf]  ;;  %v2430_v4 = vor.u32 %v2650_v37, %v2429_v18  ;;  %v2141_v6 = vld [vmem:[#allocation10 + $0xc8] sm:$0xf]  ;;  %v2277_v2 = vld [vmem:[#allocation10 + $0x1d0] sm:$0xf] }
 0x205   : > { %1668 = vmatmul.bf16.vlgmr.msra.gmra.mxu3 %v3103_v49  ;;  %1642 = vmatmul.bf16.vlgmr.msra.gmra.mxu1 %v3103_v49  ;;  %v2175_v63 = vld [vmem:[#allocation10 + $0x128] sm:$0xf0]  ;;  %v2578_v7 = vld [vmem:[#allocation10 + $0xe4] sm:$0xf0]  ;;  %v2279_v18 = vld [vmem:[#allocation10 + $0x1f0] sm:$0xf0] }
 0x206   : > { %1686 = vmatpush.bf16.msrb.mxu1 %v2526_v27  ;;  %1712 = vmatpush.bf16.msrb.mxu3 %v2530_v32  ;;  %v2646_v0 = vld [vmem:[#allocation10 + $0x30c] sm:$0xf]  ;;  %v2178_v5 = vor.u32 %v2582_v62, %v2175_v63  ;;  %v2397_v8 = vld [vmem:[#allocation10 + $0x2c8] sm:$0xf]  ;;  %v2142_v61 = vor.u32 %v2578_v7, %v2141_v6  ;;  %v2671_v62 = vld [vmem:[#allocation10 + $0x3d4] sm:$0xf] }
 0x207   : > { %v2431_v1 = vld [vmem:[#allocation10 + $0x328] sm:$0xf0]  ;;  %v2642_v11 = vld [vmem:[#allocation10 + $0x2e4] sm:$0xf0]  ;;  %v2535_v63 = vld [vmem:[#allocation10 + $0x3f0] sm:$0xf0] }
 0x208   : > { %1674 = vmatpush.bf16.msrb.mxu0 %v2238_v40  ;;  %1700 = vmatpush.bf16.msrb.mxu2 %v2242_v42  ;;  %v2434_v10 = vor.u32 %v2646_v0, %v2431_v1  ;;  %v2574_v12 = vld [vmem:[#allocation10 + $0xcc] sm:$0xf]  ;;  %v2398_v16 = vor.u32 %v2642_v11, %v2397_v8  ;;  %v2109_v9 = vld [vmem:[#allocation10 + $0x88] sm:$0xf]  ;;  %v2603_v6 = vld [vmem:[#allocation10 + $0x1ac] sm:$0xf0]  ;;  %v2538_v8 = vor.u32 %v2671_v62, %v2535_v63 }
 0x209   : > { %v2143_v13 = vld [vmem:[#allocation10 + $0xe8] sm:$0xf0]  ;;  %v2570_v17 = vld [vmem:[#allocation10 + $0xa4] sm:$0xf0]  ;;  %v2501_v7 = vld [vmem:[#allocation10 + $0x390] sm:$0xf] }
 0x20a   : > { %1687 = vmatpush.bf16.msrb.mxu1 %v2494_v41  ;;  %1713 = vmatpush.bf16.msrb.mxu3 %v2498_v50  ;;  %v2638_v14 = vld [vmem:[#allocation10 + $0x2cc] sm:$0xf]  ;;  %v2146_v59 = vor.u32 %v2574_v12, %v2143_v13  ;;  %v2365_v19 = vld [vmem:[#allocation10 + $0x288] sm:$0xf]  ;;  %v2110_v26 = vor.u32 %v2570_v17, %v2109_v9  ;;  %v2599_v11 = vld [vmem:[#allocation10 + $0x194] sm:$0xf] }
 0x20b   : > { %v2399_v15 = vld [vmem:[#allocation10 + $0x2e8] sm:$0xf0]  ;;  %v2634_v21 = vld [vmem:[#allocation10 + $0x2a4] sm:$0xf0]  ;;  %v2247_v12 = vld [vmem:[#allocation10 + $0x1b0] sm:$0xf0] }
 0x20c   : > { %1675 = vmatpush.bf16.msrb.mxu0 %v2206_v54  ;;  %1701 = vmatpush.bf16.msrb.mxu2 %v2210_v56  ;;  %v2402_v20 = vor.u32 %v2638_v14, %v2399_v15  ;;  %v2566_v22 = vld [vmem:[#allocation10 + $0x8c] sm:$0xf]  ;;  %v2366_v27 = vor.u32 %v2634_v21, %v2365_v19  ;;  %v2077_v29 = vld [vmem:[#allocation10 + $0x48] sm:$0xf]  ;;  %v2611_v54 = vld [vmem:[#allocation10 + $0x1ec] sm:$0xf0] }
 0x20d   : > { %v2111_v23 = vld [vmem:[#allocation10 + $0xa8] sm:$0xf0]  ;;  %v2562_v30 = vld [vmem:[#allocation10 + $0x64] sm:$0xf0]  ;;  %v2278_v1 = vor.u32 %v2611_v54, %v2277_v2  ;;  %v2663_v13 = vld [vmem:[#allocation10 + $0x394] sm:$0xf] }
 0x20e   : > { %1688 = vmatpush.bf16.msrb.mxu1 %v2462_v55  ;;  %1714 = vmatpush.bf16.msrb.mxu3 %v2466_v60  ;;  %v2630_v24 = vld [vmem:[#allocation10 + $0x28c] sm:$0xf]  ;;  %v2114_v28 = vor.u32 %v2566_v22, %v2111_v23  ;;  %v2333_v31 = vld [vmem:[#allocation10 + $0x248] sm:$0xf]  ;;  %v2078_v39 = vor.u32 %v2562_v30, %v2077_v29  ;;  %v2533_v55 = vld [vmem:[#allocation10 + $0x3d0] sm:$0xf] }
 0x20f   : > { %v2367_v25 = vld [vmem:[#allocation10 + $0x2a8] sm:$0xf0]  ;;  %v2626_v33 = vld [vmem:[#allocation10 + $0x264] sm:$0xf0]  ;;  %v2503_v14 = vld [vmem:[#allocation10 + $0x3b0] sm:$0xf0] }
 0x210   : > { %1676 = vmatpush.bf16.msrb.mxu0 %v2174_v3  ;;  %1702 = vmatpush.bf16.msrb.mxu2 %v2178_v5  ;;  %v2370_v32 = vor.u32 %v2630_v24, %v2367_v25  ;;  %v2558_v34 = vld [vmem:[#allocation10 + $0x4c] sm:$0xf]  ;;  %v2045_v40 = vld [vmem:[#allocation10 + $0x8] sm:$0xf]  ;;  %v2334_v42 = vor.u32 %v2626_v33, %v2333_v31  ;;  %v2534_v3 = vor.u32 %v2675_v57, %v2533_v55  ;;  %v2245_v5 = vld [vmem:[#allocation10 + $0x190] sm:$0xf] }
 0x211   : > { %v2079_v35 = vld [vmem:[#allocation10 + $0x68] sm:$0xf0]  ;;  %v2554_v41 = vld [vmem:[#allocation10 + $0x24] sm:$0xf0]  ;;  %v2246_v15 = vor.u32 %v2603_v6, %v2245_v5  ;;  %v2595_v9 = vld [vmem:[#allocation10 + $0x16c] sm:$0xf0]  ;;  %v2506_v19 = vor.u32 %v2663_v13, %v2503_v14 }
 0x212   : > { %1689 = vmatpush.bf16.msrb.mxu1 %v2430_v4  ;;  %1715 = vmatpush.bf16.msrb.mxu3 %v2434_v10  ;;  %v2622_v36 = vld [vmem:[#allocation10 + $0x24c] sm:$0xf]  ;;  %v2082_v43 = vor.u32 %v2558_v34, %v2079_v35  ;;  %v2301_v44 = vld [vmem:[#allocation10 + $0x208] sm:$0xf]  ;;  %v2046_v56 = vor.u32 %v2554_v41, %v2045_v40  ;;  %v2282_v4 = vor.u32 %v2607_v58, %v2279_v18  ;;  %v2667_v10 = vld [vmem:[#allocation10 + $0x3ac] sm:$0xf0] }
 0x213   : > { %v2335_v38 = vld [vmem:[#allocation10 + $0x268] sm:$0xf0]  ;;  %v2618_v45 = vld [vmem:[#allocation10 + $0x224] sm:$0xf0]  ;;  %v2469_v17 = vld [vmem:[#allocation10 + $0x350] sm:$0xf] }
 0x214   : > { %1677 = vmatpush.bf16.msrb.mxu0 %v2142_v61  ;;  %1703 = vmatpush.bf16.msrb.mxu2 %v2146_v59  ;;  %v2550_v50 = vld [vmem:[#allocation10 + $0xc] sm:$0xf]  ;;  %v2338_v51 = vor.u32 %v2622_v36, %v2335_v38  ;;  %v2302_v60 = vor.u32 %v2618_v45, %v2301_v44  ;;  %v2502_v61 = vor.u32 %v2667_v10, %v2501_v7  ;;  %v2213_v59 = vld [vmem:[#allocation10 + $0x150] sm:$0xf]  ;;  %v2591_v21 = vld [vmem:[#allocation10 + $0x154] sm:$0xf] }
 0x215   : > { %v2047_v52 = vld [vmem:[#allocation10 + $0x28] sm:$0xf0]  ;;  %v2215_v22 = vld [vmem:[#allocation10 + $0x170] sm:$0xf0]  ;;  %v2214_v25 = vor.u32 %v2595_v9, %v2213_v59  ;;  %v2587_v29 = vld [vmem:[#allocation10 + $0x12c] sm:$0xf0] }
 0x216   : > { %1690 = vmatpush.bf16.msrb.mxu1 %v2398_v16  ;;  %1716 = vmatpush.bf16.msrb.mxu3 %v2402_v20  ;;  %v2614_v53 = vld [vmem:[#allocation10 + $0x20c] sm:$0xf]  ;;  %v2050_v37 = vor.u32 %v2550_v50, %v2047_v52  ;;  %v2250_v16 = vor.u32 %v2599_v11, %v2247_v12  ;;  %v2659_v20 = vld [vmem:[#allocation10 + $0x36c] sm:$0xf0]  ;;  %v2655_v23 = vld [vmem:[#allocation10 + $0x354] sm:$0xf] }
 0x217   : > { %v2303_v47 = vld [vmem:[#allocation10 + $0x228] sm:$0xf0]  ;;  %v2471_v24 = vld [vmem:[#allocation10 + $0x370] sm:$0xf0]  ;;  %v2437_v30 = vld [vmem:[#allocation10 + $0x310] sm:$0xf] }
 0x218   : > { %1678 = vmatpush.bf16.msrb.mxu0 %v2110_v26  ;;  %1704 = vmatpush.bf16.msrb.mxu2 %v2114_v28  ;;  %v2306_v0 = vor.u32 %v2614_v53, %v2303_v47  ;;  %v2470_v26 = vor.u32 %v2659_v20, %v2469_v17  ;;  %v2181_v28 = vld [vmem:[#allocation10 + $0x110] sm:$0xf]  ;;  %v2474_v31 = vor.u32 %v2655_v23, %v2471_v24  ;;  %v2583_v33 = vld [vmem:[#allocation10 + $0x114] sm:$0xf]  ;;  %v2285_v24 = vld [vmem:[#allocation10 + $0x1d8] sm:$0xf] }
 0x219   : > { %v2183_v34 = vld [vmem:[#allocation10 + $0x130] sm:$0xf0]  ;;  %v2182_v38 = vor.u32 %v2587_v29, %v2181_v28  ;;  %v2149_v41 = vld [vmem:[#allocation10 + $0xd0] sm:$0xf]  ;;  %v2676_v28 = vld [vmem:[#allocation10 + $0x3f4] sm:$0xf0] }
 0x21a   : > { %1691 = vmatpush.bf16.msrb.mxu1 %v2366_v27  ;;  %1717 = vmatpush.bf16.msrb.mxu3 %v2370_v32  ;;  %v2218_v27 = vor.u32 %v2591_v21, %v2215_v22  ;;  %v2651_v32 = vld [vmem:[#allocation10 + $0x32c] sm:$0xf0]  ;;  %v2647_v35 = vld [vmem:[#allocation10 + $0x314] sm:$0xf]  ;;  %v2186_v40 = vor.u32 %v2583_v33, %v2183_v34  ;;  %v2608_v29 = vld [vmem:[#allocation10 + $0x1dc] sm:$0xf] }
 0x21b   : > { %v2439_v36 = vld [vmem:[#allocation10 + $0x330] sm:$0xf0]  ;;  %v2643_v45 = vld [vmem:[#allocation10 + $0x2ec] sm:$0xf0]  ;;  %v2672_v33 = vld [vmem:[#allocation10 + $0x3dc] sm:$0xf] }
 0x21c   : > { %1679 = vmatpush.bf16.msrb.mxu0 %v2078_v39  ;;  %1705 = vmatpush.bf16.msrb.mxu2 %v2082_v43  ;;  %v2438_v39 = vor.u32 %v2651_v32, %v2437_v30  ;;  %v2405_v43 = vld [vmem:[#allocation10 + $0x2d0] sm:$0xf]  ;;  %v2442_v44 = vor.u32 %v2647_v35, %v2439_v36  ;;  %v2575_v50 = vld [vmem:[#allocation10 + $0xd4] sm:$0xf]  ;;  %v2287_v30 = vld [vmem:[#allocation10 + $0x1f8] sm:$0xf0] }
 0x21d   : > { %v2639_v52 = vld [vmem:[#allocation10 + $0x2d4] sm:$0xf]  ;;  %v2406_v2 = vor.u32 %v2643_v45, %v2405_v43  ;;  %v2117_v55 = vld [vmem:[#allocation10 + $0x90] sm:$0xf]  ;;  %v2543_v34 = vld [vmem:[#allocation10 + $0x3f8] sm:$0xf0] }
 0x21e   : > { %1692 = vmatpush.bf16.msrb.mxu1 %v2334_v42  ;;  %1718 = vmatpush.bf16.msrb.mxu3 %v2338_v51  ;;  %v2579_v42 = vld [vmem:[#allocation10 + $0xec] sm:$0xf0]  ;;  %v2151_v51 = vld [vmem:[#allocation10 + $0xf0] sm:$0xf0]  ;;  %v2546_v43 = vor.u32 %v2672_v33, %v2543_v34  ;;  %v2600_v45 = vld [vmem:[#allocation10 + $0x19c] sm:$0xf] }
 0x21f   : > { %v2407_v53 = vld [vmem:[#allocation10 + $0x2f0] sm:$0xf0]  ;;  %v2150_v47 = vor.u32 %v2579_v42, %v2149_v41  ;;  %v2154_v54 = vor.u32 %v2575_v50, %v2151_v51  ;;  %v2373_v57 = vld [vmem:[#allocation10 + $0x290] sm:$0xf]  ;;  %v2604_v41 = vld [vmem:[#allocation10 + $0x1b4] sm:$0xf0] }
 0x220   : > { %1680 = vmatpush.bf16.msrb.mxu0 %v2046_v56  ;;  %1706 = vmatpush.bf16.msrb.mxu2 %v2050_v37  ;;  %v2571_v56 = vld [vmem:[#allocation10 + $0xac] sm:$0xf0]  ;;  %v2410_v58 = vor.u32 %v2639_v52, %v2407_v53  ;;  %v2119_v37 = vld [vmem:[#allocation10 + $0xb0] sm:$0xf0]  ;;  %v2509_v42 = vld [vmem:[#allocation10 + $0x398] sm:$0xf] }
 0x221   : > { %v2635_v18 = vld [vmem:[#allocation10 + $0x2ac] sm:$0xf0]  ;;  %v2631_v62 = vld [vmem:[#allocation10 + $0x294] sm:$0xf]  ;;  %v2255_v50 = vld [vmem:[#allocation10 + $0x1b8] sm:$0xf0] }
 0x222   : > { %1693 = vmatpush.bf16.msrb.mxu1 %v2302_v60  ;;  %1719 = vmatpush.bf16.msrb.mxu3 %v2306_v0  ;;  %v2567_v60 = vld [vmem:[#allocation10 + $0x94] sm:$0xf]  ;;  %v2118_v0 = vor.u32 %v2571_v56, %v2117_v55  ;;  %v2563_v5 = vld [vmem:[#allocation10 + $0x6c] sm:$0xf0]  ;;  %v2664_v51 = vld [vmem:[#allocation10 + $0x39c] sm:$0xf] }
 0x223   : > { %1707 = vmatmul.bf16.vlgmr.msrb.gmra.mxu2 %v3101_v48  ;;  %1681 = vmatmul.bf16.vlgmr.msrb.gmra.mxu0 %v3101_v48  ;;  %v2375_v63 = vld [vmem:[#allocation10 + $0x2b0] sm:$0xf0]  ;;  %v2341_v6 = vld [vmem:[#allocation10 + $0x250] sm:$0xf]  ;;  %v2511_v52 = vld [vmem:[#allocation10 + $0x3b8] sm:$0xf0] }
 0x224   : > { %1725 = vmatpush.bf16.msra.mxu0 %v2278_v1  ;;  %1751 = vmatpush.bf16.msra.mxu2 %v2282_v4  ;;  %v2374_v1 = vor.u32 %v2635_v18, %v2373_v57  ;;  %v2085_v4 = vld [vmem:[#allocation10 + $0x50] sm:$0xf]  ;;  %v2378_v7 = vor.u32 %v2631_v62, %v2375_v63  ;;  %v2559_v10 = vld [vmem:[#allocation10 + $0x54] sm:$0xf]  ;;  %v2596_v55 = vld [vmem:[#allocation10 + $0x174] sm:$0xf0]  ;;  %v2514_v57 = vor.u32 %v2664_v51, %v2511_v52 }
 0x225   : > { %1720 = vmatmul.bf16.vlgmr.msrb.gmra.mxu3 %v3103_v49  ;;  %1694 = vmatmul.bf16.vlgmr.msrb.gmra.mxu1 %v3103_v49  ;;  %v2087_v11 = vld [vmem:[#allocation10 + $0x70] sm:$0xf0]  ;;  %v2086_v14 = vor.u32 %v2563_v5, %v2085_v4  ;;  %v2309_v9 = vld [vmem:[#allocation10 + $0x210] sm:$0xf]  ;;  %v2477_v56 = vld [vmem:[#allocation10 + $0x358] sm:$0xf] }
 0x226   : > { %1738 = vmatpush.bf16.msra.mxu1 %v2534_v3  ;;  %1764 = vmatpush.bf16.msra.mxu3 %v2538_v8  ;;  %v2122_v3 = vor.u32 %v2567_v60, %v2119_v37  ;;  %v2627_v8 = vld [vmem:[#allocation10 + $0x26c] sm:$0xf0]  ;;  %v2623_v12 = vld [vmem:[#allocation10 + $0x254] sm:$0xf]  ;;  %v2090_v59 = vor.u32 %v2559_v10, %v2087_v11  ;;  %v2592_v18 = vld [vmem:[#allocation10 + $0x15c] sm:$0xf] }
 0x227   : > { %v2343_v13 = vld [vmem:[#allocation10 + $0x270] sm:$0xf0]  ;;  %v2619_v17 = vld [vmem:[#allocation10 + $0x22c] sm:$0xf0]  ;;  %v2223_v60 = vld [vmem:[#allocation10 + $0x178] sm:$0xf0] }
 0x228   : > { %1726 = vmatpush.bf16.msra.mxu0 %v2246_v15  ;;  %1752 = vmatpush.bf16.msra.mxu2 %v2250_v16  ;;  %v2053_v15 = vld [vmem:[#allocation10 + $0x10] sm:$0xf]  ;;  %v2342_v16 = vor.u32 %v2627_v8, %v2341_v6  ;;  %v2346_v20 = vor.u32 %v2623_v12, %v2343_v13  ;;  %v2055_v21 = vld [vmem:[#allocation10 + $0x30] sm:$0xf0]  ;;  %v2656_v37 = vld [vmem:[#allocation10 + $0x35c] sm:$0xf] }
 0x229   : > { %v2615_v22 = vld [vmem:[#allocation10 + $0x214] sm:$0xf]  ;;  %v2479_v62 = vld [vmem:[#allocation10 + $0x378] sm:$0xf0]  ;;  %v2588_v4 = vld [vmem:[#allocation10 + $0x134] sm:$0xf0] }
 0x22a   : > { %1739 = vmatpush.bf16.msra.mxu1 %v2502_v61  ;;  %1765 = vmatpush.bf16.msra.mxu3 %v2506_v19  ;;  %v2555_v61 = vld [vmem:[#allocation10 + $0x2c] sm:$0xf0]  ;;  %v2551_v19 = vld [vmem:[#allocation10 + $0x14] sm:$0xf]  ;;  %v2445_v5 = vld [vmem:[#allocation10 + $0x318] sm:$0xf]  ;;  %v2482_v6 = vor.u32 %v2656_v37, %v2479_v62 }
 0x22b   : > { %v2311_v23 = vld [vmem:[#allocation10 + $0x230] sm:$0xf0]  ;;  %v2058_v32 = vor.u32 %v2551_v19, %v2055_v21  ;;  %v2584_v8 = vld [vmem:[#allocation10 + $0x11c] sm:$0xf] }
 0x22c   : > { %1727 = vmatpush.bf16.msra.mxu0 %v2214_v25  ;;  %1753 = vmatpush.bf16.msra.mxu2 %v2218_v27  ;;  %v2612_v25 = vld [vmem:[#allocation10 + $0x1f4] sm:$0xf0]  ;;  %v2054_v27 = vor.u32 %v2555_v61, %v2053_v15  ;;  %v2314_v35 = vor.u32 %v2615_v22, %v2311_v23  ;;  %v2191_v10 = vld [vmem:[#allocation10 + $0x138] sm:$0xf0] }
 0x22d   : > { %v2286_v36 = vor.u32 %v2612_v25, %v2285_v24  ;;  %v2648_v11 = vld [vmem:[#allocation10 + $0x31c] sm:$0xf]  ;;  %v2194_v15 = vor.u32 %v2584_v8, %v2191_v10  ;;  %v2157_v61 = vld [vmem:[#allocation10 + $0xd8] sm:$0xf] }
 0x22e   : > { %1740 = vmatpush.bf16.msra.mxu1 %v2470_v26  ;;  %1766 = vmatpush.bf16.msra.mxu3 %v2474_v31  ;;  %v2541_v26 = vld [vmem:[#allocation10 + $0x3d8] sm:$0xf]  ;;  %v2310_v31 = vor.u32 %v2619_v17, %v2309_v9  ;;  %v2447_v12 = vld [vmem:[#allocation10 + $0x338] sm:$0xf0] }
 0x22f   : > { %v2450_v9 = vor.u32 %v2648_v11, %v2447_v12  ;;  %v2644_v17 = vld [vmem:[#allocation10 + $0x2f4] sm:$0xf0]  ;;  %v2576_v19 = vld [vmem:[#allocation10 + $0xdc] sm:$0xf] }
 0x230   : > { %1728 = vmatpush.bf16.msra.mxu0 %v2182_v38  ;;  %1754 = vmatpush.bf16.msra.mxu2 %v2186_v40  ;;  %v2542_v38 = vor.u32 %v2676_v28, %v2541_v26  ;;  %v2253_v40 = vld [vmem:[#allocation10 + $0x198] sm:$0xf]  ;;  %v2640_v21 = vld [vmem:[#allocation10 + $0x2dc] sm:$0xf] }
 0x231   : > { %v2254_v53 = vor.u32 %v2604_v41, %v2253_v40  ;;  %v2415_v22 = vld [vmem:[#allocation10 + $0x2f8] sm:$0xf0]  ;;  %v2125_v26 = vld [vmem:[#allocation10 + $0x98] sm:$0xf] }
 0x232   : > { %1741 = vmatpush.bf16.msra.mxu1 %v2438_v39  ;;  %1767 = vmatpush.bf16.msra.mxu3 %v2442_v44  ;;  %v2290_v39 = vor.u32 %v2608_v29, %v2287_v30  ;;  %v2668_v44 = vld [vmem:[#allocation10 + $0x3b4] sm:$0xf0]  ;;  %v2418_v29 = vor.u32 %v2640_v21, %v2415_v22  ;;  %v2632_v33 = vld [vmem:[#allocation10 + $0x29c] sm:$0xf] }
 0x233   : > { %v2381_v28 = vld [vmem:[#allocation10 + $0x298] sm:$0xf]  ;;  %v2383_v34 = vld [vmem:[#allocation10 + $0x2b8] sm:$0xf0] }
 0x234   : > { %1729 = vmatpush.bf16.msra.mxu0 %v2150_v47  ;;  %1755 = vmatpush.bf16.msra.mxu2 %v2154_v54  ;;  %v2510_v47 = vor.u32 %v2668_v44, %v2509_v42  ;;  %v2221_v54 = vld [vmem:[#allocation10 + $0x158] sm:$0xf]  ;;  %v2386_v42 = vor.u32 %v2632_v33, %v2383_v34  ;;  %v2560_v44 = vld [vmem:[#allocation10 + $0x5c] sm:$0xf] }
 0x235   : > { %v2222_v63 = vor.u32 %v2596_v55, %v2221_v54  ;;  %v2636_v30 = vld [vmem:[#allocation10 + $0x2b4] sm:$0xf0]  ;;  %v2351_v51 = vld [vmem:[#allocation10 + $0x278] sm:$0xf0] }
 0x236   : > { %1742 = vmatpush.bf16.msra.mxu1 %v2406_v2  ;;  %1768 = vmatpush.bf16.msra.mxu3 %v2410_v58  ;;  %v2258_v2 = vor.u32 %v2600_v45, %v2255_v50  ;;  %v2660_v58 = vld [vmem:[#allocation10 + $0x374] sm:$0xf0]  ;;  %v2095_v45 = vld [vmem:[#allocation10 + $0x78] sm:$0xf0] }
 0x237   : > { %v2564_v40 = vld [vmem:[#allocation10 + $0x74] sm:$0xf0]  ;;  %v2624_v50 = vld [vmem:[#allocation10 + $0x25c] sm:$0xf] }
 0x238   : > { %1730 = vmatpush.bf16.msra.mxu0 %v2118_v0  ;;  %1756 = vmatpush.bf16.msra.mxu2 %v2122_v3  ;;  %v2478_v0 = vor.u32 %v2660_v58, %v2477_v56  ;;  %v2189_v3 = vld [vmem:[#allocation10 + $0x118] sm:$0xf]  ;;  %v2354_v56 = vor.u32 %v2624_v50, %v2351_v51  ;;  %v2552_v58 = vld [vmem:[#allocation10 + $0x1c] sm:$0xf] }
 0x239   : > { %v2190_v13 = vor.u32 %v2588_v4, %v2189_v3  ;;  %v2349_v41 = vld [vmem:[#allocation10 + $0x258] sm:$0xf]  ;;  %v2319_v37 = vld [vmem:[#allocation10 + $0x238] sm:$0xf0] }
 0x23a   : > { %1743 = vmatpush.bf16.msra.mxu1 %v2374_v1  ;;  %1769 = vmatpush.bf16.msra.mxu3 %v2378_v7  ;;  %v2226_v1 = vor.u32 %v2592_v18, %v2223_v60  ;;  %v2652_v7 = vld [vmem:[#allocation10 + $0x334] sm:$0xf0]  ;;  %v2063_v18 = vld [vmem:[#allocation10 + $0x38] sm:$0xf0] }
 0x23b   : > { %v2556_v54 = vld [vmem:[#allocation10 + $0x34] sm:$0xf0]  ;;  %v2616_v60 = vld [vmem:[#allocation10 + $0x21c] sm:$0xf] }
 0x23c   : > { %1731 = vmatpush.bf16.msra.mxu0 %v2086_v14  ;;  %1757 = vmatpush.bf16.msra.mxu2 %v2090_v59  ;;  %v2446_v14 = vor.u32 %v2652_v7, %v2445_v5  ;;  %v2413_v59 = vld [vmem:[#allocation10 + $0x2d8] sm:$0xf]  ;;  %v844_v51 = vld [vmem:[%s842_s28] ss:$8 sm:$0xf0] }
 0x23d   : > { %v2414_v24 = vor.u32 %v2644_v17, %v2413_v59  ;;  %v2317_v55 = vld [vmem:[#allocation10 + $0x218] sm:$0xf] }
 0x23e   : > { %1744 = vmatpush.bf16.msra.mxu1 %v2342_v16  ;;  %1770 = vmatpush.bf16.msra.mxu3 %v2346_v20  ;;  %v2580_v16 = vld [vmem:[#allocation10 + $0xf4] sm:$0xf0]  ;;  %v2159_v20 = vld [vmem:[#allocation10 + $0xf8] sm:$0xf0] }
 0x23f   : > { %v2158_v23 = vor.u32 %v2580_v16, %v2157_v61  ;;  %v2162_v25 = vor.u32 %v2576_v19, %v2159_v20 }
 0x240   : > { %1732 = vmatpush.bf16.msra.mxu0 %v2054_v27  ;;  %1758 = vmatpush.bf16.msra.mxu2 %v2058_v32  ;;  %v2572_v27 = vld [vmem:[#allocation10 + $0xb4] sm:$0xf0]  ;;  %v2127_v32 = vld [vmem:[#allocation10 + $0xb8] sm:$0xf0] }
 0x242   : > { %1745 = vmatpush.bf16.msra.mxu1 %v2310_v31  ;;  %1771 = vmatpush.bf16.msra.mxu3 %v2314_v35  ;;  %v2568_v31 = vld [vmem:[#allocation10 + $0x9c] sm:$0xf]  ;;  %v2126_v35 = vor.u32 %v2572_v27, %v2125_v26 }
 0x243   : > { %1759 = vmatmul.bf16.vlgmr.msra.gmra.mxu2 %v3101_v48  ;;  %1733 = vmatmul.bf16.vlgmr.msra.gmra.mxu0 %v3101_v48 }
 0x244   : > { %1777 = vmatpush.bf16.msrb.mxu0 %v2286_v36  ;;  %1803 = vmatpush.bf16.msrb.mxu2 %v2290_v39  ;;  %v2382_v36 = vor.u32 %v2636_v30, %v2381_v28  ;;  %v2093_v39 = vld [vmem:[#allocation10 + $0x58] sm:$0xf] }
 0x245   : > { %1772 = vmatmul.bf16.vlgmr.msra.gmra.mxu3 %v3103_v49  ;;  %1746 = vmatmul.bf16.vlgmr.msra.gmra.mxu1 %v3103_v49  ;;  %v2094_v52 = vor.u32 %v2564_v40, %v2093_v39 }
 0x246   : > { %1790 = vmatpush.bf16.msrb.mxu1 %v2542_v38  ;;  %1816 = vmatpush.bf16.msrb.mxu3 %v2546_v43  ;;  %v2130_v38 = vor.u32 %v2568_v31, %v2127_v32  ;;  %v2628_v43 = vld [vmem:[#allocation10 + $0x274] sm:$0xf0] }
 0x248   : > { %1778 = vmatpush.bf16.msrb.mxu0 %v2254_v53  ;;  %1804 = vmatpush.bf16.msrb.mxu2 %v2258_v2  ;;  %v2350_v53 = vor.u32 %v2628_v43, %v2349_v41  ;;  %v2061_v2 = vld [vmem:[#allocation10 + $0x18] sm:$0xf]  ;;  %v843_v41 = vld [vmem:[%s842_s28] ss:$8 sm:$0xf] }
 0x249   : > { %v2062_v62 = vor.u32 %v2556_v54, %v2061_v2  ;;  %v845_v2 = vor.u32 %v844_v51, %v843_v41 }
 0x24a   : > { %1791 = vmatpush.bf16.msrb.mxu1 %v2510_v47  ;;  %1817 = vmatpush.bf16.msrb.mxu3 %v2514_v57  ;;  %v2098_v47 = vor.u32 %v2560_v44, %v2095_v45  ;;  %v2620_v57 = vld [vmem:[#allocation10 + $0x234] sm:$0xf0] }
 0x24c   : > { %1779 = vmatpush.bf16.msrb.mxu0 %v2222_v63  ;;  %1805 = vmatpush.bf16.msrb.mxu2 %v2226_v1  ;;  %v2318_v63 = vor.u32 %v2620_v57, %v2317_v55  ;;  %v2322_v1 = vor.u32 %v2616_v60, %v2319_v37 }
 0x24e   : > { %1792 = vmatpush.bf16.msrb.mxu1 %v2478_v0  ;;  %1818 = vmatpush.bf16.msrb.mxu3 %v2482_v6  ;;  %v2066_v0 = vor.u32 %v2552_v58, %v2063_v18 }
 0x250   : > { %1780 = vmatpush.bf16.msrb.mxu0 %v2190_v13  ;;  %1806 = vmatpush.bf16.msrb.mxu2 %v2194_v15 }
 0x252   : > { %1793 = vmatpush.bf16.msrb.mxu1 %v2446_v14  ;;  %1819 = vmatpush.bf16.msrb.mxu3 %v2450_v9 }
 0x254   : > { %1781 = vmatpush.bf16.msrb.mxu0 %v2158_v23  ;;  %1807 = vmatpush.bf16.msrb.mxu2 %v2162_v25 }
 0x256   : > { %1794 = vmatpush.bf16.msrb.mxu1 %v2414_v24  ;;  %1820 = vmatpush.bf16.msrb.mxu3 %v2418_v29 }
 0x258   : > { %1782 = vmatpush.bf16.msrb.mxu0 %v2126_v35  ;;  %1808 = vmatpush.bf16.msrb.mxu2 %v2130_v38 }
 0x25a   : > { %1795 = vmatpush.bf16.msrb.mxu1 %v2382_v36  ;;  %1821 = vmatpush.bf16.msrb.mxu3 %v2386_v42 }
 0x25c   : > { %1783 = vmatpush.bf16.msrb.mxu0 %v2094_v52  ;;  %1809 = vmatpush.bf16.msrb.mxu2 %v2098_v47 }
 0x25e   : > { %1796 = vmatpush.bf16.msrb.mxu1 %v2350_v53  ;;  %1822 = vmatpush.bf16.msrb.mxu3 %v2354_v56 }
 0x260   : > { %1784 = vmatpush.bf16.msrb.mxu0 %v2062_v62  ;;  %1810 = vmatpush.bf16.msrb.mxu2 %v2066_v0 }
 0x262   : > { %1797 = vmatpush.bf16.msrb.mxu1 %v2318_v63  ;;  %1823 = vmatpush.bf16.msrb.mxu3 %v2322_v1 }
 0x263   : > { %1785 = vmatmul.bf16.vlgmr.msrb.gmra.mxu0 %v3101_v48  ;;  %1811 = vmatmul.bf16.vlgmr.msrb.gmra.mxu2 %v3101_v48 }
 0x265   : > { %1798 = vmatmul.bf16.vlgmr.msrb.gmra.mxu1 %v3103_v49  ;;  %1824 = vmatmul.bf16.vlgmr.msrb.gmra.mxu3 %v3103_v49 }
 0x280   : > { %v1630_v4 = vpop.f32.mrf.mxu0 }
 0x282   : > { %v1643_v3 = vpop.f32.mrf.mxu1 }
 0x283   : > { %v1644_v5 = vadd.f32 %v1643_v3, %v1630_v4 }
 0x286   : > { %v1656_v6 = vpop.f32.mrf.mxu2 }
 0x288   : > { %v1669_v7 = vpop.f32.mrf.mxu3  ;;  %v1632_v13 = vpop.f32.mrf.mxu0 }
 0x289   : > { %v1670_v8 = vadd.f32 %v1669_v7, %v1656_v6 }
 0x28a   : > { %v1645_v11 = vpop.f32.mrf.mxu1 }
 0x28b   : > { %v1837_v10 = vrot.slane %v1670_v8, 7 }
 0x28d   : > { %v1845_v12 = vsel %vm1844_vm7, %v1644_v5, %v1837_v10 }
 0x28e   : > { %v1658_v14 = vpop.f32.mrf.mxu2 }
 0x290   : > { %v1671_v15 = vpop.f32.mrf.mxu3 }
 0x2a0   : > { %v1682_v61 = vpop.f32.mrf.mxu0 }
 0x2a2   : > { %v1695_v16 = vpop.f32.mrf.mxu1 }
 0x2a3   : > { %v1696_v59 = vadd.f32 %v1695_v16, %v1682_v61 }
 0x2a5   : > { %v1838_v17 = vrot.slane %v1696_v59, 6 }
 0x2a6   : > { %v1708_v9 = vpop.f32.mrf.mxu2 }
 0x2a8   : > { %v1721_v48 = vpop.f32.mrf.mxu3  ;;  %v1684_v19 = vpop.f32.mrf.mxu0 }
 0x2a9   : > { %v1722_v49 = vadd.f32 %v1721_v48, %v1708_v9 }
 0x2aa   : > { %v1697_v21 = vpop.f32.mrf.mxu1 }
 0x2ab   : > { %v1839_v20 = vrot.slane %v1722_v49, 5 }
 0x2ad   : > { %v1847_v22 = vsel %vm1846_vm8, %v1838_v17, %v1839_v20 }
 0x2ae   : > { %v1849_v23 = vsel %vm1848_vm9, %v1845_v12, %v1847_v22  ;;  %v1710_v24 = vpop.f32.mrf.mxu2 }
 0x2b0   : > { %v1723_v25 = vpop.f32.mrf.mxu3 }
 0x2c0   : > { %v1734_v26 = vpop.f32.mrf.mxu0 }
 0x2c2   : > { %v1747_v27 = vpop.f32.mrf.mxu1 }
 0x2c3   : > { %v1748_v36 = vadd.f32 %v1747_v27, %v1734_v26 }
 0x2c5   : > { %v1840_v44 = vrot.slane %v1748_v36, 4 }
 0x2c6   : > { %v1760_v28 = vpop.f32.mrf.mxu2 }
 0x2c8   : > { %v1773_v29 = vpop.f32.mrf.mxu3  ;;  %v1736_v30 = vpop.f32.mrf.mxu0 }
 0x2c9   : > { %v1774_v38 = vadd.f32 %v1773_v29, %v1760_v28 }
 0x2ca   : > { %v1749_v31 = vpop.f32.mrf.mxu1 }
 0x2cb   : > { %v1841_v45 = vrot.slane %v1774_v38, 3 }
 0x2cd   : > { %v1851_v54 = vsel %vm1850_vm10, %v1840_v44, %v1841_v45 }
 0x2ce   : > { %v1762_v32 = vpop.f32.mrf.mxu2 }
 0x2d0   : > { %v1775_v33 = vpop.f32.mrf.mxu3 }
 0x2e0   : > { %v1786_v34 = vpop.f32.mrf.mxu0 }
 0x2e2   : > { %v1799_v35 = vpop.f32.mrf.mxu1 }
 0x2e3   : > { %v1800_v39 = vadd.f32 %v1799_v35, %v1786_v34 }
 0x2e5   : > { %v1842_v50 = vrot.slane %v1800_v39, 2 }
 0x2e6   : > { %v1812_v40 = vpop.f32.mrf.mxu2 }
 0x2e8   : > { %v1825_v42 = vpop.f32.mrf.mxu3  ;;  %v1788_v43 = vpop.f32.mrf.mxu0 }
 0x2e9   : > { %v1826_v52 = vadd.f32 %v1825_v42, %v1812_v40 }
 0x2ea   : > { %v1801_v53 = vpop.f32.mrf.mxu1 }
 0x2eb   : > { %v1843_v47 = vrot.slane %v1826_v52, 1 }
 0x2ed   : > { %v1853_v55 = vsel %vm1852_vm11, %v1842_v50, %v1843_v47 }
 0x2ee   : > { %v1855_v56 = vsel %vm1854_vm12, %v1851_v54, %v1853_v55  ;;  %v1814_v58 = vpop.f32.mrf.mxu2 }
 0x2ef   : > { %v1857_v57 = vsel %vm1856_vm13, %v1849_v23, %v1855_v56 }
 0x2f0   : > { %v1859_v18 = vadd.f32 %v1857_v57, %v845_v2  ;;  %v1827_v60 = vpop.f32.mrf.mxu3 }
 0x2f2   : > { %v1860_v37 = vmul.f32 0.5, %v1859_v18  ;;  %v1865_v62 = vrot.slane %v1859_v18, 2  ;;  %v1874_v0 = vrot.slane %v1859_v18, 6  ;;  %v1871_v1 = vrot.slane %v1859_v18, 4 }
 0x2f4   : > { %2730 = vtanh.f32 %v1860_v37  ;;  %v1867_v63 = vmul.f32 0.5, %v1865_v62  ;;  %v1876_v3 = vmul.f32 0.5, %v1874_v0 }
 0x2f6   : > { %2732 = vtanh.f32 %v1867_v63 }
 0x2f7   : > { %2734 = vtanh.f32 %v1871_v1 }
 0x2f8   : > { %2736 = vtanh.f32 %v1876_v3 }
 0x2fa   : > { %v2731_v4 = vpop.eup %2730 }
 0x2fb   : > { %v1862_v5 = vmul.f32 0.5, %v2731_v4 }
 0x2fc   : > { %v2733_v6 = vpop.eup %2732 }
 0x2fd   : > { %v1863_v7 = vadd.f32 0.5, %v1862_v5  ;;  %v1869_v8 = vmul.f32 0.5, %v2733_v6  ;;  %v2735_v11 = vpop.eup %2734 }
 0x2fe   : > { %v2737_v14 = vpop.eup %2736 }
 0x2ff   : > { %v1870_v10 = vadd.f32 0.5, %v1869_v8  ;;  %v1881_v13 = vmul.f32 %v2735_v11, %v1863_v7  ;;  %v1878_v15 = vmul.f32 0.5, %v2737_v14 }
 0x301   : > { %v1880_v12 = vmul.f32 %v2888_v46, %v1870_v10  ;;  %v1879_v61 = vadd.f32 0.5, %v1878_v15 }
 0x303   : > { %v1882_v46 = vadd.f32 %v1881_v13, %v1880_v12  }
 0x305   : > { %2738 = vtanh.f32 %v1882_v46 }
 0x30a   :  { %832 = sbr.rel (!%p829_p1) target bundleno = 480 (0x1e0), region = 84 }
 0x30b   : > { %v2739_v16 = vpop.eup %2738 }
 0x30c   : > { %v1884_v59 = vmul.f32 %v2739_v16, %v1879_v61  }
 0x30e   : > { %v3163_v47 = vmov %v1884_v59  ;;  %v3164_v45 = vmov (%p829_p1), %v1884_v59 }
 0x30f PF:  { %v1900_v9 = vld [vmem:[#allocation11 + $0x78] sm:$0xff]  ;;  %v1899_v48 = vld [vmem:[#allocation11 + $0x70] sm:$0xff]  ;;  %v1898_v19 = vld [vmem:[#allocation11 + $0x68] sm:$0xff]  ;;  %v1919_v51 = vperm.slane %v2900_v45, 0  ;;  %v1920_v53 = vperm.slane %v2900_v45, 1  ;;  %vm1971_vm15 = vcmask 1040384   ;;  %v2900_v45 = vphi %v3082_v45, %v3164_v45  }
 0x310   :  { %v1916_v17 = vld [vmem:[#allocation11 + $0xf8] sm:$0xff]  ;;  %1923 = vmatpush.msra.mxu0 %v1900_v9  ;;  %v1915_v49 = vld [vmem:[#allocation11 + $0xf0] sm:$0xff]  ;;  %v1914_v20 = vld [vmem:[#allocation11 + $0xe8] sm:$0xff]  ;;  %s1986_s16 = sshll.u32 %s3160_s10, 4  ;;  %vm1977_vm0 = vcmask 0   ;;  %s1987_s16 = int_to_ptr.hbm [resolvable:$true] %s1986_s16 }
 0x311   :  { %1943 = vmatpush.msra.mxu1 %v1916_v17  ;;  %v1897_v21 = vld [vmem:[#allocation11 + $0x60] sm:$0xff]  ;;  %v1896_v46 = vld [vmem:[#allocation11 + $0x58] sm:$0xff]  ;;  %v1895_v24 = vld [vmem:[#allocation11 + $0x50] sm:$0xff] }
 0x312   :  { %1924 = vmatpush.msra.mxu0 %v1899_v48  ;;  %v1913_v22 = vld [vmem:[#allocation11 + $0xe0] sm:$0xff]  ;;  %v1912_v23 = vld [vmem:[#allocation11 + $0xd8] sm:$0xff]  ;;  %v1911_v25 = vld [vmem:[#allocation11 + $0xd0] sm:$0xff] }
 0x313   :  { %1944 = vmatpush.msra.mxu1 %v1915_v49  ;;  %v1894_v26 = vld [vmem:[#allocation11 + $0x48] sm:$0xff]  ;;  %v1893_v28 = vld [vmem:[#allocation11 + $0x40] sm:$0xff]  ;;  %v1892_v30 = vld [vmem:[#allocation11 + $0x38] sm:$0xff] }
 0x314   :  { %1925 = vmatpush.msra.mxu0 %v1898_v19  ;;  %v1910_v27 = vld [vmem:[#allocation11 + $0xc8] sm:$0xff]  ;;  %v1909_v29 = vld [vmem:[#allocation11 + $0xc0] sm:$0xff]  ;;  %v1908_v31 = vld [vmem:[#allocation11 + $0xb8] sm:$0xff] }
 0x315   :  { %1945 = vmatpush.msra.mxu1 %v1914_v20  ;;  %v1891_v32 = vld [vmem:[#allocation11 + $0x30] sm:$0xff]  ;;  %v1890_v34 = vld [vmem:[#allocation11 + $0x28] sm:$0xff]  ;;  %v1889_v36 = vld [vmem:[#allocation11 + $0x20] sm:$0xff] }
 0x316   :  { %1926 = vmatpush.msra.mxu0 %v1897_v21  ;;  %v1907_v33 = vld [vmem:[#allocation11 + $0xb0] sm:$0xff]  ;;  %v1906_v35 = vld [vmem:[#allocation11 + $0xa8] sm:$0xff]  ;;  %v1905_v38 = vld [vmem:[#allocation11 + $0xa0] sm:$0xff] }
 0x317   :  { %1946 = vmatpush.msra.mxu1 %v1913_v22  ;;  %v1888_v39 = vld [vmem:[#allocation11 + $0x18] sm:$0xff]  ;;  %v1887_v41 = vld [vmem:[#allocation11 + $0x10] sm:$0xff]  ;;  %v1886_v43 = vld [vmem:[#allocation11 + $0x8] sm:$0xff] }
 0x318   :  { %1927 = vmatpush.msra.mxu0 %v1896_v46  ;;  %v1904_v40 = vld [vmem:[#allocation11 + $0x98] sm:$0xff]  ;;  %v1903_v42 = vld [vmem:[#allocation11 + $0x90] sm:$0xff]  ;;  %v1902_v44 = vld [vmem:[#allocation11 + $0x88] sm:$0xff] }
 0x319   :  { %1947 = vmatpush.msra.mxu1 %v1912_v23  ;;  %v1885_v50 = vld [vmem:[#allocation11] sm:$0xff]  ;;  %v1917_v47 = vld [vmem:[%s3157_s7] sm:$0x1]  ;;  %s2919_s7 = smov [#allocation13]  }
 0x31a   :  { %1928 = vmatpush.msra.mxu0 %v1895_v24  ;;  %v1901_v52 = vld [vmem:[#allocation11 + $0x80] sm:$0xff]  ;;  %v1969_v45 = vld [vmem:[%s3158_s8] sm:$0x1]  ;;  %s1984_s13 = sshll.u32 %s2919_s7, 4  ;;  %s1985_s13 = int_to_ptr.vmem [resolvable:$true] %s1984_s13 }
 0x31b   :  { %1948 = vmatpush.msra.mxu1 %v1911_v25  ;;  %v1975_v0 = vld [vmem:[#allocation4] sm:$0x1] }
 0x31c   :  { %1929 = vmatpush.msra.mxu0 %v1894_v26 }
 0x31d   :  { %1949 = vmatpush.msra.mxu1 %v1910_v27 }
 0x31e   :  { %1930 = vmatpush.msra.mxu0 %v1893_v28 }
 0x31f   :  { %1950 = vmatpush.msra.mxu1 %v1909_v29 }
 0x320   :  { %1931 = vmatpush.msra.mxu0 %v1892_v30 }
 0x321   :  { %1951 = vmatpush.msra.mxu1 %v1908_v31 }
 0x322   :  { %1932 = vmatpush.msra.mxu0 %v1891_v32 }
 0x323   :  { %1952 = vmatpush.msra.mxu1 %v1907_v33 }
 0x324   :  { %1933 = vmatpush.msra.mxu0 %v1890_v34 }
 0x325   :  { %1953 = vmatpush.msra.mxu1 %v1906_v35 }
 0x326   :  { %1934 = vmatpush.msra.mxu0 %v1889_v36 }
 0x327   :  { %1954 = vmatpush.msra.mxu1 %v1905_v38 }
 0x328   :  { %1935 = vmatpush.msra.mxu0 %v1888_v39 }
 0x329   :  { %1955 = vmatpush.msra.mxu1 %v1904_v40 }
 0x32a   :  { %1936 = vmatpush.msra.mxu0 %v1887_v41 }
 0x32b   :  { %1956 = vmatpush.msra.mxu1 %v1903_v42 }
 0x32c   :  { %1937 = vmatpush.msra.mxu0 %v1886_v43 }
 0x32d   :  { %1957 = vmatpush.msra.mxu1 %v1902_v44 }
 0x32e   :  { %1938 = vmatpush.msra.mxu0 %v1885_v50 }
 0x32f   :  { %1958 = vmatpush.msra.mxu1 %v1901_v52  ;;  %1939 = vmatmul.f32.vlgmr.msra.gmra.mxu0 %v1919_v51 }
 0x330   :  { %1959 = vmatmul.f32.vlgmr.msra.gmra.mxu1 %v1920_v53 }
 0x3ac   :  { %v1940_v2 = vpop.f32.mrf.mxu0 }
 0x3ad   :  { %v1960_v54 = vpop.f32.mrf.mxu1  ;;  %v1941_v55 = vadd.f32 %v1940_v2, %v1917_v47 }
 0x3af   :  { %v1961_v56 = vadd.f32 %v1960_v54, %v1941_v55 }
 0x3b1   :  { %v1963_v57 = vmin.f32 %v1961_v56, 0.0  ;;  %vm1967_vm14 = vcmp.gt.f32.partialorder %v1961_v56, 0.0 }
 0x3b3   :  { %v1964_v58 = vmul.f32 1.442695, %v1963_v57 }
 0x3b5   :  { %2740 = vpow2.f32 %v1964_v58 }
 0x3bb   :  { %v2741_v18 = vpop.eup %2740 }
 0x3bc   :  { %v2547_v60 = vadd.f32 -1.0, %v2741_v18 }
 0x3be   :  { %v1968_v37 = vsel %vm1967_vm14, %v1961_v56, %v2547_v60 }
 0x3bf   :  { %v1970_v62 = vmul.f32 %v1969_v45, %v1968_v37 }
 0x3c1   :  { %v1972_v63 = vsel %vm1971_vm15, %v1970_v62, 0.0 }
 0x3c2   :  { %1973 = vadd.xlane.f32.xlu0 %v1972_v63 }
 0x435   :  { %v1974_v1 = vpop.xlane.xlu0 %1973 }
 0x436   :  { %v1976_v3 = vadd.f32 %v1975_v0, %v1974_v1 }
 0x438   :  { %1978 = vst.msk [vmem:[#allocation13] sm:$0x1] %vm1977_vm0, %v1976_v3 }
 0x439   :  { %1989 = dma.vmem_to_hbm [thread:$0]  %s1985_s13, 16, %s1987_s16, [#allocation7]  }
 0x43a   :  { %2884 = dma.done.wait [#allocation7], 16  }
 0x43b   :  { %2885 = vsyncadd [#allocation7], 4294967280 }
 0x43c   :  { %1994 = vsyncpa [#allocation6], 1 }
 0x43d   :  { %1995 = vsyncpa [#allocation9], 1 }
 0x43e   :  { %1996 = vsyncpa [#allocation12], 1 }
 0x43f   :  { %1997 = vsyncpa [#allocation7], 1 }

</bundles_post_ra>
